<compile_context>
chip_gen: v5e
topology: v5e:2x2
jax: 0.10.0
libtpu: 0.0.40
codegen_flags: <defaults>
</compile_context>

<pallas_src>
import functools

import jax
import jax.numpy as jnp
from jax import lax
from jax.experimental import pallas as pl
from jax.experimental.pallas import tpu as pltpu


def _round_up(n: int, m: int) -> int:
    return ((n + m - 1) // m) * m


def gru_kernel(x_ref,      # (T*Bp, I)   all timesteps, time-major, batch-padded
               wi_ref,     # (I, 3Hp)    fused input->gate weights (r|z|n blocks)
               bx_ref,     # (1, 3Hp)    folded biases: [b_ir+b_hr | b_iz+b_hz | b_in]
               wh_ref,     # (Hp, 3Hp)   fused hidden->gate weights
               bhn_ref,    # (1, Hp)     b_hn (stays inside r * (...))
               wfc_ref,    # (Hp, Cp)    final Linear weight (transposed, padded)
               bfc_ref,    # (1, Cp)     final Linear bias (padded)
               out_ref,    # (Bp, Cp)    logits (padded)
               xp_ref,     # VMEM scratch (T*Bp, 3Hp) input pre-activations
               *, seq_len: int, bp: int, hp: int):
    # 1) Hoisted input projection for ALL timesteps: one big MXU matmul.
    xp_ref[...] = (
        jnp.dot(x_ref[...], wi_ref[...], preferred_element_type=jnp.float32)
        + bx_ref[...]
    )

    # Hoist the bias broadcast out of the serial loop (JAX does not CSE it).
    bhn = jnp.broadcast_to(bhn_ref[...], (bp, hp))

    # 2) Serial time recurrence fully in-kernel: one fused (Bp,Hp)@(Hp,3Hp)
    #    MXU matmul per step; h carried in vregs.
    def step(t, h):
        row = pl.multiple_of(t * bp, 8)
        gx = xp_ref[pl.ds(row, bp), :]                        # (Bp, 3Hp), biases folded
        gh = jnp.dot(h, wh_ref[...], preferred_element_type=jnp.float32)
        r = jax.nn.sigmoid(gx[:, :hp] + gh[:, :hp])
        z = jax.nn.sigmoid(gx[:, hp:2 * hp] + gh[:, hp:2 * hp])
        n = jnp.tanh(gx[:, 2 * hp:] + r * (gh[:, 2 * hp:] + bhn))
        return (1.0 - z) * n + z * h                          # PyTorch GRU update

    h_last = lax.fori_loop(0, seq_len, step,
                           jnp.zeros((bp, hp), jnp.float32), unroll=True)

    # 3) Final Linear on the last hidden state (dropout = identity in eval).
    out_ref[...] = (
        jnp.dot(h_last, wfc_ref[...], preferred_element_type=jnp.float32)
        + bfc_ref[...]
    ).astype(out_ref.dtype)


def _pack_params(params, Hp: int, Cp: int):
    """Fuse + pad PyTorch-layout GRU/Linear params for the kernel."""
    w_ih, w_hh = params["w_ih"], params["w_hh"]      # (3H, I), (3H, H)
    b_ih, b_hh = params["b_ih"], params["b_hh"]      # (3H,),   (3H,)
    H = w_hh.shape[1]
    I = w_ih.shape[1]
    C = params["w_fc"].shape[0]

    wir, wiz, win = jnp.split(w_ih, 3, axis=0)       # (H, I) each, gate order r,z,n
    whr, whz, whn = jnp.split(w_hh, 3, axis=0)       # (H, H) each
    bir, biz, bin_ = jnp.split(b_ih, 3)
    bhr, bhz, bhn = jnp.split(b_hh, 3)

    wi_cat = jnp.zeros((I, 3 * Hp), jnp.float32)
    wh_cat = jnp.zeros((Hp, 3 * Hp), jnp.float32)
    bx_cat = jnp.zeros((1, 3 * Hp), jnp.float32)
    gate_data = [(wir, whr, bir + bhr),              # r: fold b_ir + b_hr
                 (wiz, whz, biz + bhz),              # z: fold b_iz + b_hz
                 (win, whn, bin_)]                   # n: only b_in (b_hn stays in kernel)
    for g, (wi_g, wh_g, bx_g) in enumerate(gate_data):
        wi_cat = wi_cat.at[:, g * Hp: g * Hp + H].set(wi_g.T)
        wh_cat = wh_cat.at[:H, g * Hp: g * Hp + H].set(wh_g.T)
        bx_cat = bx_cat.at[0, g * Hp: g * Hp + H].set(bx_g)

    bhn_p = jnp.zeros((1, Hp), jnp.float32).at[0, :H].set(bhn)
    wfc_p = jnp.zeros((Hp, Cp), jnp.float32).at[:H, :C].set(params["w_fc"].T)
    bfc_p = jnp.zeros((1, Cp), jnp.float32).at[0, :C].set(params["b_fc"])
    return wi_cat, bx_cat, wh_cat, bhn_p, wfc_p, bfc_p


def gru_classifier_forward(x_btd, params):
    """x_btd: (B, T, I) float32, batch-first like the PyTorch module."""
    B, T, I = x_btd.shape
    H = params["w_hh"].shape[1]
    C = params["w_fc"].shape[0]

    Bp = _round_up(B, 8)        # sublane-aligned batch
    Hp = _round_up(H, 128)      # lane-aligned hidden (gate slices at 128 boundaries)
    Cp = _round_up(C, 128)      # lane-dense logits store

    wi_cat, bx_cat, wh_cat, bhn_p, wfc_p, bfc_p = _pack_params(params, Hp, Cp)

    # Time-major, batch padded to Bp, flattened to (T*Bp, I) for one big matmul.
    x_tbi = jnp.transpose(x_btd, (1, 0, 2))
    x_pad = jnp.zeros((T, Bp, I), jnp.float32).at[:, :B, :].set(x_tbi)
    x_flat = x_pad.reshape(T * Bp, I)

    vmem = pl.BlockSpec(memory_space=pltpu.MemorySpace.VMEM)
    kernel = functools.partial(gru_kernel, seq_len=T, bp=Bp, hp=Hp)

    out = pl.pallas_call(
        kernel,
        out_shape=jax.ShapeDtypeStruct((Bp, Cp), jnp.float32),
        in_specs=[vmem] * 7,
        out_specs=vmem,
        scratch_shapes=[pltpu.VMEM((T * Bp, 3 * Hp), jnp.float32)],
    )(x_flat, wi_cat, bx_cat, wh_cat, bhn_p, wfc_p, bfc_p)

    return out[:B, :C]


def gru_classifier_reference(x_btd, params):
    """Pure-JAX reference (lax.scan) matching PyTorch nn.GRU + Linear."""
    H = params["w_hh"].shape[1]
    wir, wiz, win = jnp.split(params["w_ih"], 3, axis=0)
    whr, whz, whn = jnp.split(params["w_hh"], 3, axis=0)
    bir, biz, bin_ = jnp.split(params["b_ih"], 3)
    bhr, bhz, bhn = jnp.split(params["b_hh"], 3)
    B = x_btd.shape[0]
    h0 = jnp.zeros((B, H), jnp.float32)

    def step(h, x_t):
        r = jax.nn.sigmoid(x_t @ wir.T + bir + h @ whr.T + bhr)
        z = jax.nn.sigmoid(x_t @ wiz.T + biz + h @ whz.T + bhz)
        n = jnp.tanh(x_t @ win.T + bin_ + r * (h @ whn.T + bhn))
        return (1.0 - z) * n + z * h, None

    h_last, _ = lax.scan(step, h0, jnp.transpose(x_btd, (1, 0, 2)))
    return h_last @ params["w_fc"].T + params["b_fc"]


def init_params(key, input_size, hidden_size, num_classes):
    """PyTorch-layout params, U(-1/sqrt(H), 1/sqrt(H)) like nn.GRU/nn.Linear."""
    H, I, C = hidden_size, input_size, num_classes
    bound = 1.0 / jnp.sqrt(jnp.float32(H))
    keys = jax.random.split(key, 6)
    u = lambda k, shape: jax.random.uniform(
        k, shape, jnp.float32, minval=-bound, maxval=bound)
    return {
        "w_ih": u(keys[0], (3 * H, I)),   # gate order r, z, n (PyTorch layout)
        "w_hh": u(keys[1], (3 * H, H)),
        "b_ih": u(keys[2], (3 * H,)),
        "b_hh": u(keys[3], (3 * H,)),
        "w_fc": u(keys[4], (C, H)),
        "b_fc": u(keys[5], (C,)),
    }


if __name__ == "__main__":
    B, T, INPUT_SIZE, HIDDEN, CLASSES = 2, 8, 16, 32, 2

    key = jax.random.PRNGKey(0)
    k_x, k_p = jax.random.split(key)
    x = jax.random.normal(k_x, (B, T, INPUT_SIZE), jnp.float32)  # batch-first
    params = init_params(k_p, INPUT_SIZE, HIDDEN, CLASSES)

    logits = gru_classifier_forward(x, params)
    logits = jax.block_until_ready(logits)

    ref = gru_classifier_reference(x, params)
    assert logits.shape == (B, CLASSES)
    assert jnp.allclose(logits, ref, atol=1e-4, rtol=1e-4), (logits, ref)

    print("KERNEL_OK")
</pallas_src>

<mosaic_0001>
module attributes {stable_mosaic.version = 11 : i64} {
  func.func @gru_kernel(%arg0: memref<64x16xf32, #tpu.memory_space<vmem>>, %arg1: memref<16x384xf32, #tpu.memory_space<vmem>>, %arg2: memref<1x384xf32, #tpu.memory_space<vmem>>, %arg3: memref<128x384xf32, #tpu.memory_space<vmem>>, %arg4: memref<1x128xf32, #tpu.memory_space<vmem>>, %arg5: memref<128x128xf32, #tpu.memory_space<vmem>>, %arg6: memref<1x128xf32, #tpu.memory_space<vmem>>, %arg7: memref<8x128xf32, #tpu.memory_space<vmem>>, %arg8: memref<64x384xf32, #tpu.memory_space<vmem>>) attributes {dimension_semantics = [], scalar_prefetch = 0 : i64, scratch_operands = 1 : i64, tpu.core_type = #tpu.core_type<tc>} {
    %c0 = arith.constant 0 : index
    %c0_0 = arith.constant 0 : index
    %0 = vector.load %arg0[%c0, %c0_0] : memref<64x16xf32, #tpu.memory_space<vmem>>, vector<64x16xf32>
    %c0_1 = arith.constant 0 : index
    %c0_2 = arith.constant 0 : index
    %1 = vector.load %arg1[%c0_1, %c0_2] : memref<16x384xf32, #tpu.memory_space<vmem>>, vector<16x384xf32>
    %cst = arith.constant dense<0.000000e+00> : vector<64x384xf32>
    %2 = tpu.matmul %0, %1, %cst {dimension_numbers = #tpu.dot_dimension_numbers<[1], [0], [0], [1], [0, 0, 1, 1], [], []>} : vector<64x16xf32>, vector<16x384xf32>, vector<64x384xf32> -> vector<64x384xf32>
    %c0_3 = arith.constant 0 : index
    %c0_4 = arith.constant 0 : index
    %3 = vector.load %arg2[%c0_3, %c0_4] : memref<1x384xf32, #tpu.memory_space<vmem>>, vector<1x384xf32>
    %4 = vector.broadcast %3 : vector<1x384xf32> to vector<64x384xf32>
    %5 = arith.addf %2, %4 : vector<64x384xf32>
    %c0_5 = arith.constant 0 : index
    %c0_6 = arith.constant 0 : index
    %6 = vector.load %arg8[%c0_5, %c0_6] : memref<64x384xf32, #tpu.memory_space<vmem>>, vector<64x384xf32>
    tpu.vector_store %arg8[%c0_5, %c0_6], %5 {strides = array<i32>} : memref<64x384xf32, #tpu.memory_space<vmem>>, vector<64x384xf32>,
    %c0_7 = arith.constant 0 : index
    %c0_8 = arith.constant 0 : index
    %7 = vector.load %arg4[%c0_7, %c0_8] : memref<1x128xf32, #tpu.memory_space<vmem>>, vector<1x128xf32>
    %8 = vector.shape_cast %7 : vector<1x128xf32> to vector<1x128xf32>
    %9 = vector.broadcast %8 : vector<1x128xf32> to vector<8x128xf32>
    %cst_9 = arith.constant 0.000000e+00 : f32
    %10 = vector.broadcast %cst_9 : f32 to vector<8x128xf32>
    %c0_i32 = arith.constant 0 : i32
    %c8_i32 = arith.constant 8 : i32
    %11 = arith.muli %c0_i32, %c8_i32 : i32
    %12 = tpu.assume_multiple %11, 8 : i32
    %13 = arith.index_cast %12 : i32 to index
    %c0_10 = arith.constant 0 : index
    %14 = vector.load %arg8[%13, %c0_10] : memref<64x384xf32, #tpu.memory_space<vmem>>, vector<8x384xf32>
    %c0_11 = arith.constant 0 : index
    %c0_12 = arith.constant 0 : index
    %15 = vector.load %arg3[%c0_11, %c0_12] : memref<128x384xf32, #tpu.memory_space<vmem>>, vector<128x384xf32>
    %cst_13 = arith.constant dense<0.000000e+00> : vector<8x384xf32>
    %16 = tpu.matmul %10, %15, %cst_13 {dimension_numbers = #tpu.dot_dimension_numbers<[1], [0], [0], [1], [0, 0, 1, 1], [], []>} : vector<8x128xf32>, vector<128x384xf32>, vector<8x384xf32> -> vector<8x384xf32>
    %17 = vector.extract_strided_slice %14 {offsets = [0, 0], sizes = [8, 128], strides = [1, 1]} : vector<8x384xf32> to vector<8x128xf32>
    %18 = vector.extract_strided_slice %16 {offsets = [0, 0], sizes = [8, 128], strides = [1, 1]} : vector<8x384xf32> to vector<8x128xf32>
    %19 = arith.addf %17, %18 : vector<8x128xf32>
    %20 = arith.negf %19 : vector<8x128xf32>
    %21 = math.exp %20 : vector<8x128xf32>
    %cst_14 = arith.constant 1.000000e+00 : f32
    %22 = vector.broadcast %cst_14 : f32 to vector<8x128xf32>
    %23 = arith.addf %22, %21 : vector<8x128xf32>
    %24 = arith.divf %22, %23 : vector<8x128xf32>
    %25 = vector.extract_strided_slice %14 {offsets = [0, 128], sizes = [8, 128], strides = [1, 1]} : vector<8x384xf32> to vector<8x128xf32>
    %26 = vector.extract_strided_slice %16 {offsets = [0, 128], sizes = [8, 128], strides = [1, 1]} : vector<8x384xf32> to vector<8x128xf32>
    %27 = arith.addf %25, %26 : vector<8x128xf32>
    %28 = arith.negf %27 : vector<8x128xf32>
    %29 = math.exp %28 : vector<8x128xf32>
    %cst_15 = arith.constant 1.000000e+00 : f32
    %30 = vector.broadcast %cst_15 : f32 to vector<8x128xf32>
    %31 = arith.addf %30, %29 : vector<8x128xf32>
    %32 = arith.divf %30, %31 : vector<8x128xf32>
    %33 = vector.extract_strided_slice %14 {offsets = [0, 256], sizes = [8, 128], strides = [1, 1]} : vector<8x384xf32> to vector<8x128xf32>
    %34 = vector.extract_strided_slice %16 {offsets = [0, 256], sizes = [8, 128], strides = [1, 1]} : vector<8x384xf32> to vector<8x128xf32>
    %35 = arith.addf %34, %9 : vector<8x128xf32>
    %36 = arith.mulf %24, %35 : vector<8x128xf32>
    %37 = arith.addf %33, %36 : vector<8x128xf32>
    %38 = math.tanh %37 : vector<8x128xf32>
    %cst_16 = arith.constant 1.000000e+00 : f32
    %39 = vector.broadcast %cst_16 : f32 to vector<8x128xf32>
    %40 = arith.subf %39, %32 : vector<8x128xf32>
    %41 = arith.mulf %40, %38 : vector<8x128xf32>
    %42 = arith.mulf %32, %10 : vector<8x128xf32>
    %43 = arith.addf %41, %42 : vector<8x128xf32>
    %c1_i32 = arith.constant 1 : i32
    %c8_i32_17 = arith.constant 8 : i32
    %44 = arith.muli %c1_i32, %c8_i32_17 : i32
    %45 = tpu.assume_multiple %44, 8 : i32
    %46 = arith.index_cast %45 : i32 to index
    %c0_18 = arith.constant 0 : index
    %47 = vector.load %arg8[%46, %c0_18] : memref<64x384xf32, #tpu.memory_space<vmem>>, vector<8x384xf32>
    %c0_19 = arith.constant 0 : index
    %c0_20 = arith.constant 0 : index
    %48 = vector.load %arg3[%c0_19, %c0_20] : memref<128x384xf32, #tpu.memory_space<vmem>>, vector<128x384xf32>
    %cst_21 = arith.constant dense<0.000000e+00> : vector<8x384xf32>
    %49 = tpu.matmul %43, %48, %cst_21 {dimension_numbers = #tpu.dot_dimension_numbers<[1], [0], [0], [1], [0, 0, 1, 1], [], []>} : vector<8x128xf32>, vector<128x384xf32>, vector<8x384xf32> -> vector<8x384xf32>
    %50 = vector.extract_strided_slice %47 {offsets = [0, 0], sizes = [8, 128], strides = [1, 1]} : vector<8x384xf32> to vector<8x128xf32>
    %51 = vector.extract_strided_slice %49 {offsets = [0, 0], sizes = [8, 128], strides = [1, 1]} : vector<8x384xf32> to vector<8x128xf32>
    %52 = arith.addf %50, %51 : vector<8x128xf32>
    %53 = arith.negf %52 : vector<8x128xf32>
    %54 = math.exp %53 : vector<8x128xf32>
    %cst_22 = arith.constant 1.000000e+00 : f32
    %55 = vector.broadcast %cst_22 : f32 to vector<8x128xf32>
    %56 = arith.addf %55, %54 : vector<8x128xf32>
    %57 = arith.divf %55, %56 : vector<8x128xf32>
    %58 = vector.extract_strided_slice %47 {offsets = [0, 128], sizes = [8, 128], strides = [1, 1]} : vector<8x384xf32> to vector<8x128xf32>
    %59 = vector.extract_strided_slice %49 {offsets = [0, 128], sizes = [8, 128], strides = [1, 1]} : vector<8x384xf32> to vector<8x128xf32>
    %60 = arith.addf %58, %59 : vector<8x128xf32>
    %61 = arith.negf %60 : vector<8x128xf32>
    %62 = math.exp %61 : vector<8x128xf32>
    %cst_23 = arith.constant 1.000000e+00 : f32
    %63 = vector.broadcast %cst_23 : f32 to vector<8x128xf32>
    %64 = arith.addf %63, %62 : vector<8x128xf32>
    %65 = arith.divf %63, %64 : vector<8x128xf32>
    %66 = vector.extract_strided_slice %47 {offsets = [0, 256], sizes = [8, 128], strides = [1, 1]} : vector<8x384xf32> to vector<8x128xf32>
    %67 = vector.extract_strided_slice %49 {offsets = [0, 256], sizes = [8, 128], strides = [1, 1]} : vector<8x384xf32> to vector<8x128xf32>
    %68 = arith.addf %67, %9 : vector<8x128xf32>
    %69 = arith.mulf %57, %68 : vector<8x128xf32>
    %70 = arith.addf %66, %69 : vector<8x128xf32>
    %71 = math.tanh %70 : vector<8x128xf32>
    %cst_24 = arith.constant 1.000000e+00 : f32
    %72 = vector.broadcast %cst_24 : f32 to vector<8x128xf32>
    %73 = arith.subf %72, %65 : vector<8x128xf32>
    %74 = arith.mulf %73, %71 : vector<8x128xf32>
    %75 = arith.mulf %65, %43 : vector<8x128xf32>
    %76 = arith.addf %74, %75 : vector<8x128xf32>
    %c2_i32 = arith.constant 2 : i32
    %c8_i32_25 = arith.constant 8 : i32
    %77 = arith.muli %c2_i32, %c8_i32_25 : i32
    %78 = tpu.assume_multiple %77, 8 : i32
    %79 = arith.index_cast %78 : i32 to index
    %c0_26 = arith.constant 0 : index
    %80 = vector.load %arg8[%79, %c0_26] : memref<64x384xf32, #tpu.memory_space<vmem>>, vector<8x384xf32>
    %c0_27 = arith.constant 0 : index
    %c0_28 = arith.constant 0 : index
    %81 = vector.load %arg3[%c0_27, %c0_28] : memref<128x384xf32, #tpu.memory_space<vmem>>, vector<128x384xf32>
    %cst_29 = arith.constant dense<0.000000e+00> : vector<8x384xf32>
    %82 = tpu.matmul %76, %81, %cst_29 {dimension_numbers = #tpu.dot_dimension_numbers<[1], [0], [0], [1], [0, 0, 1, 1], [], []>} : vector<8x128xf32>, vector<128x384xf32>, vector<8x384xf32> -> vector<8x384xf32>
    %83 = vector.extract_strided_slice %80 {offsets = [0, 0], sizes = [8, 128], strides = [1, 1]} : vector<8x384xf32> to vector<8x128xf32>
    %84 = vector.extract_strided_slice %82 {offsets = [0, 0], sizes = [8, 128], strides = [1, 1]} : vector<8x384xf32> to vector<8x128xf32>
    %85 = arith.addf %83, %84 : vector<8x128xf32>
    %86 = arith.negf %85 : vector<8x128xf32>
    %87 = math.exp %86 : vector<8x128xf32>
    %cst_30 = arith.constant 1.000000e+00 : f32
    %88 = vector.broadcast %cst_30 : f32 to vector<8x128xf32>
    %89 = arith.addf %88, %87 : vector<8x128xf32>
    %90 = arith.divf %88, %89 : vector<8x128xf32>
    %91 = vector.extract_strided_slice %80 {offsets = [0, 128], sizes = [8, 128], strides = [1, 1]} : vector<8x384xf32> to vector<8x128xf32>
    %92 = vector.extract_strided_slice %82 {offsets = [0, 128], sizes = [8, 128], strides = [1, 1]} : vector<8x384xf32> to vector<8x128xf32>
    %93 = arith.addf %91, %92 : vector<8x128xf32>
    %94 = arith.negf %93 : vector<8x128xf32>
    %95 = math.exp %94 : vector<8x128xf32>
    %cst_31 = arith.constant 1.000000e+00 : f32
    %96 = vector.broadcast %cst_31 : f32 to vector<8x128xf32>
    %97 = arith.addf %96, %95 : vector<8x128xf32>
    %98 = arith.divf %96, %97 : vector<8x128xf32>
    %99 = vector.extract_strided_slice %80 {offsets = [0, 256], sizes = [8, 128], strides = [1, 1]} : vector<8x384xf32> to vector<8x128xf32>
    %100 = vector.extract_strided_slice %82 {offsets = [0, 256], sizes = [8, 128], strides = [1, 1]} : vector<8x384xf32> to vector<8x128xf32>
    %101 = arith.addf %100, %9 : vector<8x128xf32>
    %102 = arith.mulf %90, %101 : vector<8x128xf32>
    %103 = arith.addf %99, %102 : vector<8x128xf32>
    %104 = math.tanh %103 : vector<8x128xf32>
    %cst_32 = arith.constant 1.000000e+00 : f32
    %105 = vector.broadcast %cst_32 : f32 to vector<8x128xf32>
    %106 = arith.subf %105, %98 : vector<8x128xf32>
    %107 = arith.mulf %106, %104 : vector<8x128xf32>
    %108 = arith.mulf %98, %76 : vector<8x128xf32>
    %109 = arith.addf %107, %108 : vector<8x128xf32>
    %c3_i32 = arith.constant 3 : i32
    %c8_i32_33 = arith.constant 8 : i32
    %110 = arith.muli %c3_i32, %c8_i32_33 : i32
    %111 = tpu.assume_multiple %110, 8 : i32
    %112 = arith.index_cast %111 : i32 to index
    %c0_34 = arith.constant 0 : index
    %113 = vector.load %arg8[%112, %c0_34] : memref<64x384xf32, #tpu.memory_space<vmem>>, vector<8x384xf32>
    %c0_35 = arith.constant 0 : index
    %c0_36 = arith.constant 0 : index
    %114 = vector.load %arg3[%c0_35, %c0_36] : memref<128x384xf32, #tpu.memory_space<vmem>>, vector<128x384xf32>
    %cst_37 = arith.constant dense<0.000000e+00> : vector<8x384xf32>
    %115 = tpu.matmul %109, %114, %cst_37 {dimension_numbers = #tpu.dot_dimension_numbers<[1], [0], [0], [1], [0, 0, 1, 1], [], []>} : vector<8x128xf32>, vector<128x384xf32>, vector<8x384xf32> -> vector<8x384xf32>
    %116 = vector.extract_strided_slice %113 {offsets = [0, 0], sizes = [8, 128], strides = [1, 1]} : vector<8x384xf32> to vector<8x128xf32>
    %117 = vector.extract_strided_slice %115 {offsets = [0, 0], sizes = [8, 128], strides = [1, 1]} : vector<8x384xf32> to vector<8x128xf32>
    %118 = arith.addf %116, %117 : vector<8x128xf32>
    %119 = arith.negf %118 : vector<8x128xf32>
    %120 = math.exp %119 : vector<8x128xf32>
    %cst_38 = arith.constant 1.000000e+00 : f32
    %121 = vector.broadcast %cst_38 : f32 to vector<8x128xf32>
    %122 = arith.addf %121, %120 : vector<8x128xf32>
    %123 = arith.divf %121, %122 : vector<8x128xf32>
    %124 = vector.extract_strided_slice %113 {offsets = [0, 128], sizes = [8, 128], strides = [1, 1]} : vector<8x384xf32> to vector<8x128xf32>
    %125 = vector.extract_strided_slice %115 {offsets = [0, 128], sizes = [8, 128], strides = [1, 1]} : vector<8x384xf32> to vector<8x128xf32>
    %126 = arith.addf %124, %125 : vector<8x128xf32>
    %127 = arith.negf %126 : vector<8x128xf32>
    %128 = math.exp %127 : vector<8x128xf32>
    %cst_39 = arith.constant 1.000000e+00 : f32
    %129 = vector.broadcast %cst_39 : f32 to vector<8x128xf32>
    %130 = arith.addf %129, %128 : vector<8x128xf32>
    %131 = arith.divf %129, %130 : vector<8x128xf32>
    %132 = vector.extract_strided_slice %113 {offsets = [0, 256], sizes = [8, 128], strides = [1, 1]} : vector<8x384xf32> to vector<8x128xf32>
    %133 = vector.extract_strided_slice %115 {offsets = [0, 256], sizes = [8, 128], strides = [1, 1]} : vector<8x384xf32> to vector<8x128xf32>
    %134 = arith.addf %133, %9 : vector<8x128xf32>
    %135 = arith.mulf %123, %134 : vector<8x128xf32>
    %136 = arith.addf %132, %135 : vector<8x128xf32>
    %137 = math.tanh %136 : vector<8x128xf32>
    %cst_40 = arith.constant 1.000000e+00 : f32
    %138 = vector.broadcast %cst_40 : f32 to vector<8x128xf32>
    %139 = arith.subf %138, %131 : vector<8x128xf32>
    %140 = arith.mulf %139, %137 : vector<8x128xf32>
    %141 = arith.mulf %131, %109 : vector<8x128xf32>
    %142 = arith.addf %140, %141 : vector<8x128xf32>
    %c4_i32 = arith.constant 4 : i32
    %c8_i32_41 = arith.constant 8 : i32
    %143 = arith.muli %c4_i32, %c8_i32_41 : i32
    %144 = tpu.assume_multiple %143, 8 : i32
    %145 = arith.index_cast %144 : i32 to index
    %c0_42 = arith.constant 0 : index
    %146 = vector.load %arg8[%145, %c0_42] : memref<64x384xf32, #tpu.memory_space<vmem>>, vector<8x384xf32>
    %c0_43 = arith.constant 0 : index
    %c0_44 = arith.constant 0 : index
    %147 = vector.load %arg3[%c0_43, %c0_44] : memref<128x384xf32, #tpu.memory_space<vmem>>, vector<128x384xf32>
    %cst_45 = arith.constant dense<0.000000e+00> : vector<8x384xf32>
    %148 = tpu.matmul %142, %147, %cst_45 {dimension_numbers = #tpu.dot_dimension_numbers<[1], [0], [0], [1], [0, 0, 1, 1], [], []>} : vector<8x128xf32>, vector<128x384xf32>, vector<8x384xf32> -> vector<8x384xf32>
    %149 = vector.extract_strided_slice %146 {offsets = [0, 0], sizes = [8, 128], strides = [1, 1]} : vector<8x384xf32> to vector<8x128xf32>
    %150 = vector.extract_strided_slice %148 {offsets = [0, 0], sizes = [8, 128], strides = [1, 1]} : vector<8x384xf32> to vector<8x128xf32>
    %151 = arith.addf %149, %150 : vector<8x128xf32>
    %152 = arith.negf %151 : vector<8x128xf32>
    %153 = math.exp %152 : vector<8x128xf32>
    %cst_46 = arith.constant 1.000000e+00 : f32
    %154 = vector.broadcast %cst_46 : f32 to vector<8x128xf32>
    %155 = arith.addf %154, %153 : vector<8x128xf32>
    %156 = arith.divf %154, %155 : vector<8x128xf32>
    %157 = vector.extract_strided_slice %146 {offsets = [0, 128], sizes = [8, 128], strides = [1, 1]} : vector<8x384xf32> to vector<8x128xf32>
    %158 = vector.extract_strided_slice %148 {offsets = [0, 128], sizes = [8, 128], strides = [1, 1]} : vector<8x384xf32> to vector<8x128xf32>
    %159 = arith.addf %157, %158 : vector<8x128xf32>
    %160 = arith.negf %159 : vector<8x128xf32>
    %161 = math.exp %160 : vector<8x128xf32>
    %cst_47 = arith.constant 1.000000e+00 : f32
    %162 = vector.broadcast %cst_47 : f32 to vector<8x128xf32>
    %163 = arith.addf %162, %161 : vector<8x128xf32>
    %164 = arith.divf %162, %163 : vector<8x128xf32>
    %165 = vector.extract_strided_slice %146 {offsets = [0, 256], sizes = [8, 128], strides = [1, 1]} : vector<8x384xf32> to vector<8x128xf32>
    %166 = vector.extract_strided_slice %148 {offsets = [0, 256], sizes = [8, 128], strides = [1, 1]} : vector<8x384xf32> to vector<8x128xf32>
    %167 = arith.addf %166, %9 : vector<8x128xf32>
    %168 = arith.mulf %156, %167 : vector<8x128xf32>
    %169 = arith.addf %165, %168 : vector<8x128xf32>
    %170 = math.tanh %169 : vector<8x128xf32>
    %cst_48 = arith.constant 1.000000e+00 : f32
    %171 = vector.broadcast %cst_48 : f32 to vector<8x128xf32>
    %172 = arith.subf %171, %164 : vector<8x128xf32>
    %173 = arith.mulf %172, %170 : vector<8x128xf32>
    %174 = arith.mulf %164, %142 : vector<8x128xf32>
    %175 = arith.addf %173, %174 : vector<8x128xf32>
    %c5_i32 = arith.constant 5 : i32
    %c8_i32_49 = arith.constant 8 : i32
    %176 = arith.muli %c5_i32, %c8_i32_49 : i32
    %177 = tpu.assume_multiple %176, 8 : i32
    %178 = arith.index_cast %177 : i32 to index
    %c0_50 = arith.constant 0 : index
    %179 = vector.load %arg8[%178, %c0_50] : memref<64x384xf32, #tpu.memory_space<vmem>>, vector<8x384xf32>
    %c0_51 = arith.constant 0 : index
    %c0_52 = arith.constant 0 : index
    %180 = vector.load %arg3[%c0_51, %c0_52] : memref<128x384xf32, #tpu.memory_space<vmem>>, vector<128x384xf32>
    %cst_53 = arith.constant dense<0.000000e+00> : vector<8x384xf32>
    %181 = tpu.matmul %175, %180, %cst_53 {dimension_numbers = #tpu.dot_dimension_numbers<[1], [0], [0], [1], [0, 0, 1, 1], [], []>} : vector<8x128xf32>, vector<128x384xf32>, vector<8x384xf32> -> vector<8x384xf32>
    %182 = vector.extract_strided_slice %179 {offsets = [0, 0], sizes = [8, 128], strides = [1, 1]} : vector<8x384xf32> to vector<8x128xf32>
    %183 = vector.extract_strided_slice %181 {offsets = [0, 0], sizes = [8, 128], strides = [1, 1]} : vector<8x384xf32> to vector<8x128xf32>
    %184 = arith.addf %182, %183 : vector<8x128xf32>
    %185 = arith.negf %184 : vector<8x128xf32>
    %186 = math.exp %185 : vector<8x128xf32>
    %cst_54 = arith.constant 1.000000e+00 : f32
    %187 = vector.broadcast %cst_54 : f32 to vector<8x128xf32>
    %188 = arith.addf %187, %186 : vector<8x128xf32>
    %189 = arith.divf %187, %188 : vector<8x128xf32>
    %190 = vector.extract_strided_slice %179 {offsets = [0, 128], sizes = [8, 128], strides = [1, 1]} : vector<8x384xf32> to vector<8x128xf32>
    %191 = vector.extract_strided_slice %181 {offsets = [0, 128], sizes = [8, 128], strides = [1, 1]} : vector<8x384xf32> to vector<8x128xf32>
    %192 = arith.addf %190, %191 : vector<8x128xf32>
    %193 = arith.negf %192 : vector<8x128xf32>
    %194 = math.exp %193 : vector<8x128xf32>
    %cst_55 = arith.constant 1.000000e+00 : f32
    %195 = vector.broadcast %cst_55 : f32 to vector<8x128xf32>
    %196 = arith.addf %195, %194 : vector<8x128xf32>
    %197 = arith.divf %195, %196 : vector<8x128xf32>
    %198 = vector.extract_strided_slice %179 {offsets = [0, 256], sizes = [8, 128], strides = [1, 1]} : vector<8x384xf32> to vector<8x128xf32>
    %199 = vector.extract_strided_slice %181 {offsets = [0, 256], sizes = [8, 128], strides = [1, 1]} : vector<8x384xf32> to vector<8x128xf32>
    %200 = arith.addf %199, %9 : vector<8x128xf32>
    %201 = arith.mulf %189, %200 : vector<8x128xf32>
    %202 = arith.addf %198, %201 : vector<8x128xf32>
    %203 = math.tanh %202 : vector<8x128xf32>
    %cst_56 = arith.constant 1.000000e+00 : f32
    %204 = vector.broadcast %cst_56 : f32 to vector<8x128xf32>
    %205 = arith.subf %204, %197 : vector<8x128xf32>
    %206 = arith.mulf %205, %203 : vector<8x128xf32>
    %207 = arith.mulf %197, %175 : vector<8x128xf32>
    %208 = arith.addf %206, %207 : vector<8x128xf32>
    %c6_i32 = arith.constant 6 : i32
    %c8_i32_57 = arith.constant 8 : i32
    %209 = arith.muli %c6_i32, %c8_i32_57 : i32
    %210 = tpu.assume_multiple %209, 8 : i32
    %211 = arith.index_cast %210 : i32 to index
    %c0_58 = arith.constant 0 : index
    %212 = vector.load %arg8[%211, %c0_58] : memref<64x384xf32, #tpu.memory_space<vmem>>, vector<8x384xf32>
    %c0_59 = arith.constant 0 : index
    %c0_60 = arith.constant 0 : index
    %213 = vector.load %arg3[%c0_59, %c0_60] : memref<128x384xf32, #tpu.memory_space<vmem>>, vector<128x384xf32>
    %cst_61 = arith.constant dense<0.000000e+00> : vector<8x384xf32>
    %214 = tpu.matmul %208, %213, %cst_61 {dimension_numbers = #tpu.dot_dimension_numbers<[1], [0], [0], [1], [0, 0, 1, 1], [], []>} : vector<8x128xf32>, vector<128x384xf32>, vector<8x384xf32> -> vector<8x384xf32>
    %215 = vector.extract_strided_slice %212 {offsets = [0, 0], sizes = [8, 128], strides = [1, 1]} : vector<8x384xf32> to vector<8x128xf32>
    %216 = vector.extract_strided_slice %214 {offsets = [0, 0], sizes = [8, 128], strides = [1, 1]} : vector<8x384xf32> to vector<8x128xf32>
    %217 = arith.addf %215, %216 : vector<8x128xf32>
    %218 = arith.negf %217 : vector<8x128xf32>
    %219 = math.exp %218 : vector<8x128xf32>
    %cst_62 = arith.constant 1.000000e+00 : f32
    %220 = vector.broadcast %cst_62 : f32 to vector<8x128xf32>
    %221 = arith.addf %220, %219 : vector<8x128xf32>
    %222 = arith.divf %220, %221 : vector<8x128xf32>
    %223 = vector.extract_strided_slice %212 {offsets = [0, 128], sizes = [8, 128], strides = [1, 1]} : vector<8x384xf32> to vector<8x128xf32>
    %224 = vector.extract_strided_slice %214 {offsets = [0, 128], sizes = [8, 128], strides = [1, 1]} : vector<8x384xf32> to vector<8x128xf32>
    %225 = arith.addf %223, %224 : vector<8x128xf32>
    %226 = arith.negf %225 : vector<8x128xf32>
    %227 = math.exp %226 : vector<8x128xf32>
    %cst_63 = arith.constant 1.000000e+00 : f32
    %228 = vector.broadcast %cst_63 : f32 to vector<8x128xf32>
    %229 = arith.addf %228, %227 : vector<8x128xf32>
    %230 = arith.divf %228, %229 : vector<8x128xf32>
    %231 = vector.extract_strided_slice %212 {offsets = [0, 256], sizes = [8, 128], strides = [1, 1]} : vector<8x384xf32> to vector<8x128xf32>
    %232 = vector.extract_strided_slice %214 {offsets = [0, 256], sizes = [8, 128], strides = [1, 1]} : vector<8x384xf32> to vector<8x128xf32>
    %233 = arith.addf %232, %9 : vector<8x128xf32>
    %234 = arith.mulf %222, %233 : vector<8x128xf32>
    %235 = arith.addf %231, %234 : vector<8x128xf32>
    %236 = math.tanh %235 : vector<8x128xf32>
    %cst_64 = arith.constant 1.000000e+00 : f32
    %237 = vector.broadcast %cst_64 : f32 to vector<8x128xf32>
    %238 = arith.subf %237, %230 : vector<8x128xf32>
    %239 = arith.mulf %238, %236 : vector<8x128xf32>
    %240 = arith.mulf %230, %208 : vector<8x128xf32>
    %241 = arith.addf %239, %240 : vector<8x128xf32>
    %c7_i32 = arith.constant 7 : i32
    %c8_i32_65 = arith.constant 8 : i32
    %242 = arith.muli %c7_i32, %c8_i32_65 : i32
    %243 = tpu.assume_multiple %242, 8 : i32
    %244 = arith.index_cast %243 : i32 to index
    %c0_66 = arith.constant 0 : index
    %245 = vector.load %arg8[%244, %c0_66] : memref<64x384xf32, #tpu.memory_space<vmem>>, vector<8x384xf32>
    %c0_67 = arith.constant 0 : index
    %c0_68 = arith.constant 0 : index
    %246 = vector.load %arg3[%c0_67, %c0_68] : memref<128x384xf32, #tpu.memory_space<vmem>>, vector<128x384xf32>
    %cst_69 = arith.constant dense<0.000000e+00> : vector<8x384xf32>
    %247 = tpu.matmul %241, %246, %cst_69 {dimension_numbers = #tpu.dot_dimension_numbers<[1], [0], [0], [1], [0, 0, 1, 1], [], []>} : vector<8x128xf32>, vector<128x384xf32>, vector<8x384xf32> -> vector<8x384xf32>
    %248 = vector.extract_strided_slice %245 {offsets = [0, 0], sizes = [8, 128], strides = [1, 1]} : vector<8x384xf32> to vector<8x128xf32>
    %249 = vector.extract_strided_slice %247 {offsets = [0, 0], sizes = [8, 128], strides = [1, 1]} : vector<8x384xf32> to vector<8x128xf32>
    %250 = arith.addf %248, %249 : vector<8x128xf32>
    %251 = arith.negf %250 : vector<8x128xf32>
    %252 = math.exp %251 : vector<8x128xf32>
    %cst_70 = arith.constant 1.000000e+00 : f32
    %253 = vector.broadcast %cst_70 : f32 to vector<8x128xf32>
    %254 = arith.addf %253, %252 : vector<8x128xf32>
    %255 = arith.divf %253, %254 : vector<8x128xf32>
    %256 = vector.extract_strided_slice %245 {offsets = [0, 128], sizes = [8, 128], strides = [1, 1]} : vector<8x384xf32> to vector<8x128xf32>
    %257 = vector.extract_strided_slice %247 {offsets = [0, 128], sizes = [8, 128], strides = [1, 1]} : vector<8x384xf32> to vector<8x128xf32>
    %258 = arith.addf %256, %257 : vector<8x128xf32>
    %259 = arith.negf %258 : vector<8x128xf32>
    %260 = math.exp %259 : vector<8x128xf32>
    %cst_71 = arith.constant 1.000000e+00 : f32
    %261 = vector.broadcast %cst_71 : f32 to vector<8x128xf32>
    %262 = arith.addf %261, %260 : vector<8x128xf32>
    %263 = arith.divf %261, %262 : vector<8x128xf32>
    %264 = vector.extract_strided_slice %245 {offsets = [0, 256], sizes = [8, 128], strides = [1, 1]} : vector<8x384xf32> to vector<8x128xf32>
    %265 = vector.extract_strided_slice %247 {offsets = [0, 256], sizes = [8, 128], strides = [1, 1]} : vector<8x384xf32> to vector<8x128xf32>
    %266 = arith.addf %265, %9 : vector<8x128xf32>
    %267 = arith.mulf %255, %266 : vector<8x128xf32>
    %268 = arith.addf %264, %267 : vector<8x128xf32>
    %269 = math.tanh %268 : vector<8x128xf32>
    %cst_72 = arith.constant 1.000000e+00 : f32
    %270 = vector.broadcast %cst_72 : f32 to vector<8x128xf32>
    %271 = arith.subf %270, %263 : vector<8x128xf32>
    %272 = arith.mulf %271, %269 : vector<8x128xf32>
    %273 = arith.mulf %263, %241 : vector<8x128xf32>
    %274 = arith.addf %272, %273 : vector<8x128xf32>
    %c8_i32_73 = arith.constant 8 : i32
    %c0_74 = arith.constant 0 : index
    %c0_75 = arith.constant 0 : index
    %275 = vector.load %arg5[%c0_74, %c0_75] : memref<128x128xf32, #tpu.memory_space<vmem>>, vector<128x128xf32>
    %cst_76 = arith.constant dense<0.000000e+00> : vector<8x128xf32>
    %276 = tpu.matmul %274, %275, %cst_76 {dimension_numbers = #tpu.dot_dimension_numbers<[1], [0], [0], [1], [0, 0, 1, 1], [], []>} : vector<8x128xf32>, vector<128x128xf32>, vector<8x128xf32> -> vector<8x128xf32>
    %c0_77 = arith.constant 0 : index
    %c0_78 = arith.constant 0 : index
    %277 = vector.load %arg6[%c0_77, %c0_78] : memref<1x128xf32, #tpu.memory_space<vmem>>, vector<1x128xf32>
    %278 = vector.broadcast %277 : vector<1x128xf32> to vector<8x128xf32>
    %279 = arith.addf %276, %278 : vector<8x128xf32>
    %c0_79 = arith.constant 0 : index
    %c0_80 = arith.constant 0 : index
    %280 = vector.load %arg7[%c0_79, %c0_80] : memref<8x128xf32, #tpu.memory_space<vmem>>, vector<8x128xf32>
    tpu.vector_store %arg7[%c0_79, %c0_80], %279 {strides = array<i32>} : memref<8x128xf32, #tpu.memory_space<vmem>>, vector<8x128xf32>,
    return
  }
}

</mosaic_0001>

<bundles_post_ra>
// kernel: tpu_custom_call.1
= control target key start
LH: loop header
LB: loop body
LE: loop exit
PB: predicated region body
PF: predicated region fallthrough
CT: control target
= control target key end

     0   :  { %12 = vsyncpa [#allocation4], 0  ;;  %s2371_s0 = inlined_call_operand.vmem [shape: f32[64,16], index: 0, kind: input, shape index: {}]   ;;  %s2372_s1 = inlined_call_operand.vmem [shape: f32[16,384], index: 1, kind: input, shape index: {}]   ;;  %s2373_s2 = inlined_call_operand.vmem [shape: f32[1,384], index: 2, kind: input, shape index: {}]   ;;  %s2374_s3 = inlined_call_operand.hbm [shape: f32[128,384], index: 3, kind: input, shape index: {}]   ;;  %s2375_s4 = inlined_call_operand.vmem [shape: f32[1,128], index: 4, kind: input, shape index: {}]   ;;  %s2376_s5 = inlined_call_operand.hbm [shape: f32[128,128], index: 5, kind: input, shape index: {}]   ;;  %s2377_s6 = inlined_call_operand.vmem [shape: f32[1,128], index: 6, kind: input, shape index: {}]   ;;  %s2378_s7 = inlined_call_operand.hbm [shape: f32[8,128], index: 7, kind: output, shape index: {}]  }
   0x1   :  { %13 = vsyncpa [#allocation7], 0 }
   0x2   :  { %14 = vsyncpa [#allocation5], 0  ;;  %s25_s26 = sshll.u32 %s2374_s3, 4  ;;  %s1540_s27 = smov [#allocation3]   ;;  %s26_s26 = int_to_ptr.hbm [resolvable:$true] %s25_s26 }
   0x3   :  { %s27_s28 = sshll.u32 %s1540_s27, 4  ;;  %s40_s8 = sshll.u32 %s2376_s5, 4  ;;  %s28_s28 = int_to_ptr.vmem [resolvable:$true] %s27_s28  ;;  %s41_s8 = int_to_ptr.hbm [resolvable:$true] %s40_s8 }
   0x4   :  { %s1541_s9 = smov 384   ;;  %s1542_s10 = smov 24  }
   0x5   :  { %33 = dma.hbm_to_vmem [thread:$0]  %s26_s26, 6144, %s28_s28, [#allocation4], %s1541_s9, %s1541_s9, %s1542_s10  }
   0x6   :  { %s1543_s11 = smov [#allocation6]   ;;  %s1544_s13 = smov 128  }
   0x7   :  { %s42_s12 = sshll.u32 %s1543_s11, 4  ;;  %s1545_s14 = smov 8   ;;  %s43_s12 = int_to_ptr.vmem [resolvable:$true] %s42_s12 }
   0x8   :  { %48 = dma.hbm_to_vmem [thread:$0]  %s41_s8, 2048, %s43_s12, [#allocation7], %s1544_s13, %s1544_s13, %s1545_s14  }
   0x9   :  { %1534 = dma.done.wait [#allocation4], 6144  }
   0xa   :  { %1535 = vsyncadd [#allocation4], 4294961152 }
   0xb   :  { %1536 = dma.done.wait [#allocation7], 2048  }
   0xc   :  { %1537 = vsyncadd [#allocation7], 4294965248  ;;  %v70_v0 = vld [vmem:[%s2372_s1 + $0x18] sm:$0xff]  ;;  %v1597_v1 = vld [vmem:[#allocation3 + $0x168] sm:$0xff]  ;;  %vm81_vm0 = vcmask 130048   ;;  %v1546_v39 = vmov 0.0  }
   0xd   :  { %v67_v2 = vld [vmem:[%s2372_s1] sm:$0xff]  ;;  %120 = vmatpush.msra.mxu0 %v70_v0  ;;  %311 = vmatpush.msra.mxu3 %v1597_v1  ;;  %v1603_v3 = vld [vmem:[#allocation3 + $0x150] sm:$0xff]  ;;  %v1610_v5 = vld [vmem:[#allocation3 + $0x138] sm:$0xff]  ;;  %s1547_s20 = smov [#allocation8]   ;;  %s1265_s24 = sshll.u32 %s2378_s7, 4  ;;  %s1266_s24 = int_to_ptr.hbm [resolvable:$true] %s1265_s24 }
   0xe   :  { %v1608_v4 = vld [vmem:[%s2371_s0] sm:$0xff]  ;;  %v1618_v7 = vld [vmem:[#allocation3 + $0x178] sm:$0xff]  ;;  %v1620_v8 = vld [vmem:[#allocation3 + $0x108] sm:$0xff]  ;;  %s1263_s21 = sshll.u32 %s1547_s20, 4  ;;  %s1264_s21 = int_to_ptr.vmem [resolvable:$true] %s1263_s21 }
   0xf   :  { %121 = vmatpush.msra.mxu0 %v67_v2  ;;  %312 = vmatpush.msra.mxu3 %v1603_v3  ;;  %v1615_v6 = vld [vmem:[#allocation3 + $0x120] sm:$0xff]  ;;  %v1626_v10 = vld [vmem:[#allocation3 + $0xf0] sm:$0xff]  ;;  %v1629_v11 = vld [vmem:[#allocation3 + $0x148] sm:$0xff] }
  0x10   :  { %1283 = vmatmul.msk.f32.vlgmr.msra.gmra.mxu0 %vm81_vm0, %v1608_v4  ;;  %v1624_v9 = vld [vmem:[#allocation3 + $0x160] sm:$0xff]  ;;  %v1635_v12 = vld [vmem:[%s2371_s0 + $0x8] sm:$0xff]  ;;  %v1637_v13 = vld [vmem:[#allocation3 + $0xd8] sm:$0xff] }
  0x11   :  { %313 = vmatpush.msra.mxu3 %v1610_v5  ;;  %351 = vmatpush.msrb.mxu0 %v1618_v7  ;;  %v1640_v14 = vld [vmem:[#allocation3 + $0x130] sm:$0xff]  ;;  %v1645_v15 = vld [vmem:[#allocation3 + $0xc0] sm:$0xff]  ;;  %v1647_v16 = vld [vmem:[#allocation3 + $0x118] sm:$0xff] }
  0x12   :  { %v1651_v17 = vld [vmem:[#allocation3 + $0xa8] sm:$0xff]  ;;  %v1653_v18 = vld [vmem:[#allocation3 + $0x100] sm:$0xff]  ;;  %v1657_v19 = vld [vmem:[#allocation3 + $0x90] sm:$0xff] }
  0x13   :  { %314 = vmatpush.msra.mxu3 %v1615_v6  ;;  %352 = vmatpush.msrb.mxu0 %v1624_v9  ;;  %v1663_v20 = vld [vmem:[%s2371_s0 + $0x10] sm:$0xff]  ;;  %v1666_v21 = vld [vmem:[#allocation3 + $0xe8] sm:$0xff]  ;;  %v1668_v22 = vld [vmem:[#allocation3 + $0x78] sm:$0xff] }
  0x14   :  { %v1672_v23 = vld [vmem:[#allocation3 + $0xd0] sm:$0xff]  ;;  %v1676_v24 = vld [vmem:[#allocation3 + $0x60] sm:$0xff]  ;;  %v1680_v25 = vld [vmem:[#allocation3 + $0xb8] sm:$0xff] }
  0x15   :  { %315 = vmatpush.msra.mxu3 %v1620_v8  ;;  %353 = vmatpush.msrb.mxu0 %v1629_v11  ;;  %v1682_v26 = vld [vmem:[#allocation3 + $0x48] sm:$0xff]  ;;  %v1686_v27 = vld [vmem:[#allocation3 + $0xa0] sm:$0xff]  ;;  %v1688_v28 = vld [vmem:[#allocation3 + $0x30] sm:$0xff] }
  0x16   :  { %2399 = vst [vmem:[#allocation12_spill] sm:$0xff] %v1688_v28  ;;  %v1694_v29 = vld [vmem:[%s2371_s0 + $0x18] sm:$0xff]  ;;  %v1697_v30 = vld [vmem:[#allocation3 + $0x88] sm:$0xff]  ;;  %v1703_v32 = vld [vmem:[#allocation3 + $0x70] sm:$0xff] }
  0x17   :  { %316 = vmatpush.msra.mxu3 %v1626_v10  ;;  %354 = vmatpush.msrb.mxu0 %v1640_v14  ;;  %v1699_v31 = vld [vmem:[#allocation3 + $0x18] sm:$0xff]  ;;  %v1707_v33 = vld [vmem:[#allocation3] sm:$0xff]  ;;  %v72_v34 = vld [vmem:[%s2372_s1 + $0x28] sm:$0xff] }
  0x18   :  { %1284 = vmatmul.msk.f32.gmra.mxu0 %vm81_vm0, %v1635_v12  ;;  %2400 = vst [vmem:[#allocation13_spill] sm:$0xff] %v1699_v31  ;;  %v1714_v35 = vld [vmem:[#allocation3 + $0x58] sm:$0xff]  ;;  %v1716_v36 = vld [vmem:[#allocation3 + $0x170] sm:$0xff]  ;;  %202 = vmatpush.msra.mxu2 %v72_v34  ;;  %v1723_v38 = vld [vmem:[#allocation3 + $0x40] sm:$0xff] }
  0x19   :  { %317 = vmatpush.msra.mxu3 %v1637_v13  ;;  %355 = vmatpush.msrb.mxu0 %v1647_v16  ;;  %2401 = vst [vmem:[#allocation14_spill] sm:$0xff] %v1707_v33  ;;  %v69_v37 = vld [vmem:[%s2372_s1 + $0x10] sm:$0xff]  ;;  %v1726_v40 = vld [vmem:[#allocation3 + $0x158] sm:$0xff]  ;;  %v71_v41 = vld [vmem:[%s2372_s1 + $0x20] sm:$0xff] }
  0x1a   :  { %2402 = vst [vmem:[#allocation15_spill] sm:$0xff] %v1723_v38  ;;  %203 = vmatpush.msra.mxu2 %v69_v37  ;;  %v1731_v42 = vld [vmem:[#allocation3 + $0x28] sm:$0xff]  ;;  %v1737_v43 = vld [vmem:[%s2371_s0 + $0x20] sm:$0xff]  ;;  %161 = vmatpush.msra.mxu1 %v71_v41  ;;  %v1749_v46 = vld [vmem:[#allocation3 + $0x10] sm:$0xff] }
  0x1b   :  { %318 = vmatpush.msra.mxu3 %v1645_v15  ;;  %356 = vmatpush.msrb.mxu0 %v1653_v18  ;;  %2403 = vst [vmem:[#allocation16_spill] sm:$0xff] %v1731_v42  ;;  %v68_v44 = vld [vmem:[%s2372_s1 + $0x8] sm:$0xff]  ;;  %v1743_v45 = vld [vmem:[#allocation3 + $0x140] sm:$0xff]  ;;  %v1758_v48 = vld [vmem:[#allocation3 + $0x110] sm:$0xff] }
  0x1c   :  { %1299 = vmatmul.msk.f32.vlgmr.msra.gmra.mxu2 %vm81_vm0, %v1608_v4  ;;  %2404 = vst [vmem:[#allocation17_spill] sm:$0xff] %v1749_v46  ;;  %v1753_v47 = vld [vmem:[#allocation3 + $0x128] sm:$0xff]  ;;  %162 = vmatpush.msra.mxu1 %v68_v44  ;;  %v1764_v49 = vld [vmem:[#allocation3 + $0xf8] sm:$0xff]  ;;  %v1775_v51 = vld [vmem:[#allocation3 + $0xe0] sm:$0xff] }
  0x1d   :  { %319 = vmatpush.msra.mxu3 %v1651_v17  ;;  %357 = vmatpush.msrb.mxu0 %v1666_v21  ;;  %v1772_v50 = vld [vmem:[%s2371_s0 + $0x28] sm:$0xff]  ;;  %v1790_v53 = vld [vmem:[#allocation3 + $0xb0] sm:$0xff]  ;;  %v1796_v54 = vld [vmem:[#allocation3 + $0x98] sm:$0xff] }
  0x1e   :  { %1291 = vmatmul.msk.f32.vlgmr.msra.gmra.mxu1 %vm81_vm0, %v1608_v4  ;;  %445 = vmatpush.msrb.mxu2 %v1716_v36  ;;  %v1784_v52 = vld [vmem:[#allocation3 + $0xc8] sm:$0xff]  ;;  %v1804_v55 = vld [vmem:[%s2371_s0 + $0x30] sm:$0xff]  ;;  %v1807_v56 = vld [vmem:[#allocation3 + $0x80] sm:$0xff] }
  0x1f   :  { %320 = vmatpush.msra.mxu3 %v1657_v19  ;;  %358 = vmatpush.msrb.mxu0 %v1672_v23  ;;  %v1816_v57 = vld [vmem:[#allocation3 + $0x68] sm:$0xff]  ;;  %v1822_v58 = vld [vmem:[#allocation3 + $0x50] sm:$0xff]  ;;  %v1828_v59 = vld [vmem:[#allocation3 + $0x38] sm:$0xff] }
  0x20   :  { %1285 = vmatmul.msk.f32.gmra.mxu0 %vm81_vm0, %v1663_v20  ;;  %425 = vmatpush.msrb.mxu1 %v1597_v1  ;;  %2405 = vst [vmem:[#allocation18_spill] sm:$0xff] %v1822_v58  ;;  %v1836_v60 = vld [vmem:[%s2371_s0 + $0x38] sm:$0xff]  ;;  %v1839_v61 = vld [vmem:[#allocation3 + $0x20] sm:$0xff]  ;;  %v1848_v62 = vld [vmem:[#allocation3 + $0x8] sm:$0xff] }
  0x21   :  { %321 = vmatpush.msra.mxu3 %v1668_v22  ;;  %359 = vmatpush.msrb.mxu0 %v1680_v25  ;;  %2406 = vst [vmem:[#allocation19_spill] sm:$0xff] %v1828_v59  ;;  %v73_v0 = vld [vmem:[%s2373_s2] sm:$0x7] }
  0x22   :  { %426 = vmatpush.msrb.mxu1 %v1603_v3  ;;  %446 = vmatpush.msrb.mxu2 %v1726_v40  ;;  %2407 = vst [vmem:[#allocation20_spill] sm:$0xff] %v1839_v61  ;;  %v75_v2 = vperm.slane %v73_v0, 0 }
  0x23   :  { %322 = vmatpush.msra.mxu3 %v1676_v24  ;;  %360 = vmatpush.msrb.mxu0 %v1686_v27  ;;  %2408 = vst [vmem:[#allocation21_spill] sm:$0xff] %v1848_v62 }
  0x24   :  { %1300 = vmatmul.msk.f32.gmra.mxu2 %vm81_vm0, %v1635_v12  ;;  %427 = vmatpush.msrb.mxu1 %v1610_v5 }
  0x25   :  { %323 = vmatpush.msra.mxu3 %v1682_v26  ;;  %361 = vmatpush.msrb.mxu0 %v1697_v30 }
  0x26   :  { %447 = vmatpush.msrb.mxu2 %v1743_v45  ;;  %428 = vmatpush.msrb.mxu1 %v1615_v6 }
  0x27   :  { %324 = vmatpush.msra.mxu3 %v1688_v28  ;;  %362 = vmatpush.msrb.mxu0 %v1703_v32 }
  0x28   :  { %1286 = vmatmul.msk.f32.gmra.mxu0 %vm81_vm0, %v1694_v29  ;;  %1292 = vmatmul.msk.f32.gmra.mxu1 %vm81_vm0, %v1635_v12 }
  0x29   :  { %325 = vmatpush.msra.mxu3 %v1699_v31  ;;  %363 = vmatpush.msrb.mxu0 %v1714_v35 }
  0x2a   :  { %448 = vmatpush.msrb.mxu2 %v1753_v47  ;;  %429 = vmatpush.msrb.mxu1 %v1620_v8 }
  0x2b   :  { %326 = vmatpush.msra.mxu3 %v1707_v33  ;;  %364 = vmatpush.msrb.mxu0 %v1723_v38 }
  0x2c   :  { %327 = vmatmul.f32.vlgmr.msra.gmra.mxu3 %v1546_v39  ;;  %449 = vmatpush.msrb.mxu2 %v1758_v48 }
  0x2d   :  { %331 = vmatpush.msrb.mxu3 %v1716_v36  ;;  %365 = vmatpush.msrb.mxu0 %v1731_v42 }
  0x2e   :  { %430 = vmatpush.msrb.mxu1 %v1626_v10  ;;  %1301 = vmatmul.msk.f32.gmra.mxu2 %vm81_vm0, %v1663_v20 }
  0x2f   :  { %332 = vmatpush.msrb.mxu3 %v1726_v40  ;;  %366 = vmatpush.msrb.mxu0 %v1749_v46 }
  0x30   :  { %1287 = vmatmul.msk.f32.gmra.mxu0 %vm81_vm0, %v1737_v43  ;;  %431 = vmatpush.msrb.mxu1 %v1637_v13 }
  0x31   :  { %333 = vmatpush.msrb.mxu3 %v1743_v45  ;;  %539 = vmatpush.msra.mxu0 %v1597_v1 }
  0x32   :  { %450 = vmatpush.msrb.mxu2 %v1764_v49  ;;  %432 = vmatpush.msrb.mxu1 %v1645_v15 }
  0x33   :  { %334 = vmatpush.msrb.mxu3 %v1753_v47  ;;  %540 = vmatpush.msra.mxu0 %v1603_v3 }
  0x34   :  { %1293 = vmatmul.msk.f32.gmra.mxu1 %vm81_vm0, %v1663_v20  ;;  %451 = vmatpush.msrb.mxu2 %v1775_v51 }
  0x35   :  { %335 = vmatpush.msrb.mxu3 %v1758_v48  ;;  %541 = vmatpush.msra.mxu0 %v1610_v5 }
  0x36   :  { %433 = vmatpush.msrb.mxu1 %v1651_v17  ;;  %452 = vmatpush.msrb.mxu2 %v1784_v52 }
  0x37   :  { %336 = vmatpush.msrb.mxu3 %v1764_v49  ;;  %542 = vmatpush.msra.mxu0 %v1615_v6 }
  0x38   :  { %1288 = vmatmul.msk.f32.gmra.mxu0 %vm81_vm0, %v1772_v50  ;;  %434 = vmatpush.msrb.mxu1 %v1657_v19 }
  0x39   :  { %337 = vmatpush.msrb.mxu3 %v1775_v51  ;;  %543 = vmatpush.msra.mxu0 %v1620_v8 }
  0x3a   :  { %1302 = vmatmul.msk.f32.gmra.mxu2 %vm81_vm0, %v1694_v29  ;;  %435 = vmatpush.msrb.mxu1 %v1668_v22 }
  0x3b   :  { %338 = vmatpush.msrb.mxu3 %v1784_v52  ;;  %453 = vmatpush.msrb.mxu2 %v1790_v53 }
  0x3c   :  { %436 = vmatpush.msrb.mxu1 %v1676_v24  ;;  %544 = vmatpush.msra.mxu0 %v1626_v10 }
  0x3d   :  { %339 = vmatpush.msrb.mxu3 %v1790_v53  ;;  %1294 = vmatmul.msk.f32.gmra.mxu1 %vm81_vm0, %v1694_v29 }
  0x3e   :  { %454 = vmatpush.msrb.mxu2 %v1796_v54  ;;  %437 = vmatpush.msrb.mxu1 %v1682_v26 }
  0x3f   :  { %340 = vmatpush.msrb.mxu3 %v1796_v54  ;;  %545 = vmatpush.msra.mxu0 %v1637_v13 }
  0x40   :  { %1289 = vmatmul.msk.f32.gmra.mxu0 %vm81_vm0, %v1804_v55  ;;  %455 = vmatpush.msrb.mxu2 %v1807_v56 }
  0x41   :  { %341 = vmatpush.msrb.mxu3 %v1807_v56  ;;  %438 = vmatpush.msrb.mxu1 %v1688_v28 }
  0x42   :  { %1303 = vmatmul.msk.f32.gmra.mxu2 %vm81_vm0, %v1737_v43  ;;  %546 = vmatpush.msra.mxu0 %v1645_v15 }
  0x43   :  { %342 = vmatpush.msrb.mxu3 %v1816_v57  ;;  %456 = vmatpush.msrb.mxu2 %v1816_v57 }
  0x44   :  { %439 = vmatpush.msrb.mxu1 %v1699_v31  ;;  %547 = vmatpush.msra.mxu0 %v1651_v17 }
  0x45   :  { %343 = vmatpush.msrb.mxu3 %v1822_v58  ;;  %1295 = vmatmul.msk.f32.gmra.mxu1 %vm81_vm0, %v1737_v43 }
  0x46   :  { %457 = vmatpush.msrb.mxu2 %v1822_v58  ;;  %440 = vmatpush.msrb.mxu1 %v1707_v33 }
  0x47   :  { %344 = vmatpush.msrb.mxu3 %v1828_v59  ;;  %548 = vmatpush.msra.mxu0 %v1657_v19 }
  0x48   :  { %1290 = vmatmul.msk.f32.gmra.mxu0 %vm81_vm0, %v1836_v60  ;;  %559 = vmatpush.msra.mxu1 %v1716_v36 }
  0x49   :  { %345 = vmatpush.msrb.mxu3 %v1839_v61  ;;  %458 = vmatpush.msrb.mxu2 %v1828_v59 }
  0x4a   :  { %560 = vmatpush.msra.mxu1 %v1726_v40  ;;  %1304 = vmatmul.msk.f32.gmra.mxu2 %vm81_vm0, %v1772_v50 }
  0x4b   :  { %346 = vmatpush.msrb.mxu3 %v1848_v62  ;;  %459 = vmatpush.msrb.mxu2 %v1839_v61 }
  0x4c   :  { %347 = vmatmul.f32.vlgmr.msrb.gmra.mxu3 %v1546_v39  ;;  %561 = vmatpush.msra.mxu1 %v1743_v45 }
  0x4d   :  { %465 = vmatpush.msra.mxu3 %v1618_v7  ;;  %1296 = vmatmul.msk.f32.gmra.mxu1 %vm81_vm0, %v1772_v50 }
  0x4e   :  { %460 = vmatpush.msrb.mxu2 %v1848_v62  ;;  %562 = vmatpush.msra.mxu1 %v1753_v47 }
  0x4f   :  { %466 = vmatpush.msra.mxu3 %v1624_v9  ;;  %549 = vmatpush.msra.mxu0 %v1668_v22 }
  0x50   :  { %367 = vmatmul.f32.vlgmr.msrb.gmra.mxu0 %v1546_v39  ;;  %579 = vmatpush.msra.mxu2 %v1618_v7 }
  0x51   :  { %467 = vmatpush.msra.mxu3 %v1629_v11  ;;  %563 = vmatpush.msra.mxu1 %v1758_v48 }
  0x52   :  { %580 = vmatpush.msra.mxu2 %v1624_v9  ;;  %550 = vmatpush.msra.mxu0 %v1676_v24 }
  0x53   :  { %468 = vmatpush.msra.mxu3 %v1640_v14  ;;  %1305 = vmatmul.msk.f32.gmra.mxu2 %vm81_vm0, %v1804_v55 }
  0x54   :  { %564 = vmatpush.msra.mxu1 %v1764_v49  ;;  %581 = vmatpush.msra.mxu2 %v1629_v11 }
  0x55   :  { %469 = vmatpush.msra.mxu3 %v1647_v16  ;;  %1297 = vmatmul.msk.f32.gmra.mxu1 %vm81_vm0, %v1804_v55 }
  0x56   :  { %565 = vmatpush.msra.mxu1 %v1775_v51  ;;  %582 = vmatpush.msra.mxu2 %v1640_v14 }
  0x57   :  { %470 = vmatpush.msra.mxu3 %v1653_v18  ;;  %551 = vmatpush.msra.mxu0 %v1682_v26 }
  0x58   :  { %566 = vmatpush.msra.mxu1 %v1784_v52  ;;  %583 = vmatpush.msra.mxu2 %v1647_v16 }
  0x59   :  { %471 = vmatpush.msra.mxu3 %v1666_v21  ;;  %552 = vmatpush.msra.mxu0 %v1688_v28 }
  0x5a   :  { %567 = vmatpush.msra.mxu1 %v1790_v53  ;;  %584 = vmatpush.msra.mxu2 %v1653_v18 }
  0x5b   :  { %472 = vmatpush.msra.mxu3 %v1672_v23  ;;  %1306 = vmatmul.msk.f32.gmra.mxu2 %vm81_vm0, %v1836_v60 }
  0x5c   :  { %568 = vmatpush.msra.mxu1 %v1796_v54  ;;  %553 = vmatpush.msra.mxu0 %v1699_v31 }
  0x5d   :  { %473 = vmatpush.msra.mxu3 %v1680_v25  ;;  %1298 = vmatmul.msk.f32.gmra.mxu1 %vm81_vm0, %v1836_v60 }
  0x5e   :  { %569 = vmatpush.msra.mxu1 %v1807_v56  ;;  %585 = vmatpush.msra.mxu2 %v1666_v21 }
  0x5f   :  { %474 = vmatpush.msra.mxu3 %v1686_v27  ;;  %554 = vmatpush.msra.mxu0 %v1707_v33 }
  0x60   :  { %570 = vmatpush.msra.mxu1 %v1816_v57  ;;  %586 = vmatpush.msra.mxu2 %v1672_v23 }
  0x61   :  { %475 = vmatpush.msra.mxu3 %v1697_v30  ;;  %673 = vmatpush.msrb.mxu0 %v1716_v36 }
  0x62   :  { %571 = vmatpush.msra.mxu1 %v1822_v58  ;;  %587 = vmatpush.msra.mxu2 %v1680_v25 }
  0x63   :  { %476 = vmatpush.msra.mxu3 %v1703_v32  ;;  %674 = vmatpush.msrb.mxu0 %v1726_v40 }
  0x64   :  { %572 = vmatpush.msra.mxu1 %v1828_v59  ;;  %588 = vmatpush.msra.mxu2 %v1686_v27 }
  0x65   :  { %477 = vmatpush.msra.mxu3 %v1714_v35  ;;  %675 = vmatpush.msrb.mxu0 %v1743_v45 }
  0x66   :  { %573 = vmatpush.msra.mxu1 %v1839_v61  ;;  %589 = vmatpush.msra.mxu2 %v1697_v30 }
  0x67   :  { %478 = vmatpush.msra.mxu3 %v1723_v38  ;;  %676 = vmatpush.msrb.mxu0 %v1753_v47 }
  0x68   :  { %574 = vmatpush.msra.mxu1 %v1848_v62  ;;  %590 = vmatpush.msra.mxu2 %v1703_v32 }
  0x69   :  { %479 = vmatpush.msra.mxu3 %v1731_v42  ;;  %677 = vmatpush.msrb.mxu0 %v1758_v48 }
  0x6a   :  { %591 = vmatpush.msra.mxu2 %v1714_v35 }
  0x6b   :  { %480 = vmatpush.msra.mxu3 %v1749_v46  ;;  %678 = vmatpush.msrb.mxu0 %v1764_v49 }
  0x6c   :  { %592 = vmatpush.msra.mxu2 %v1723_v38 }
  0x6d   :  { %653 = vmatpush.msrb.mxu3 %v1597_v1  ;;  %679 = vmatpush.msrb.mxu0 %v1775_v51 }
  0x6e   :  { %593 = vmatpush.msra.mxu2 %v1731_v42 }
  0x6f   :  { %654 = vmatpush.msrb.mxu3 %v1603_v3  ;;  %680 = vmatpush.msrb.mxu0 %v1784_v52 }
  0x70   :  { %594 = vmatpush.msra.mxu2 %v1749_v46 }
  0x71   :  { %655 = vmatpush.msrb.mxu3 %v1610_v5  ;;  %681 = vmatpush.msrb.mxu0 %v1790_v53 }
  0x73   :  { %656 = vmatpush.msrb.mxu3 %v1615_v6  ;;  %682 = vmatpush.msrb.mxu0 %v1796_v54 }
  0x75   :  { %657 = vmatpush.msrb.mxu3 %v1620_v8  ;;  %683 = vmatpush.msrb.mxu0 %v1807_v56 }
  0x77   :  { %658 = vmatpush.msrb.mxu3 %v1626_v10  ;;  %684 = vmatpush.msrb.mxu0 %v1816_v57 }
  0x79   :  { %659 = vmatpush.msrb.mxu3 %v1637_v13  ;;  %685 = vmatpush.msrb.mxu0 %v1822_v58 }
  0x7b   :  { %660 = vmatpush.msrb.mxu3 %v1645_v15  ;;  %686 = vmatpush.msrb.mxu0 %v1828_v59 }
  0x7d   :  { %661 = vmatpush.msrb.mxu3 %v1651_v17  ;;  %687 = vmatpush.msrb.mxu0 %v1839_v61 }
  0x7f   :  { %662 = vmatpush.msrb.mxu3 %v1657_v19  ;;  %688 = vmatpush.msrb.mxu0 %v1848_v62 }
  0x81   :  { %663 = vmatpush.msrb.mxu3 %v1668_v22 }
  0x83   :  { %664 = vmatpush.msrb.mxu3 %v1676_v24 }
  0x85   :  { %665 = vmatpush.msrb.mxu3 %v1682_v26 }
  0x87   :  { %666 = vmatpush.msrb.mxu3 %v1688_v28 }
  0x89   :  { %667 = vmatpush.msrb.mxu3 %v1699_v31 }
  0x8b   :  { %668 = vmatpush.msrb.mxu3 %v1707_v33 }
  0x8d   :  { %v123_v63 = vpop.f32.mrf.mxu0 }
  0x8e   :  { %v124_v41 = vadd.f32 %v123_v63, %v75_v2 }
  0x95   :  { %v126_v4 = vpop.f32.mrf.mxu0 }
  0x96   :  { %v1978_v12 = vadd.f32 %v126_v4, %v75_v2 }
  0x98   :  { %2409 = vst [vmem:[#allocation22_spill] sm:$0xff] %v1978_v12 }
  0x9b   :  { %v164_v63 = vpop.f32.mrf.mxu1 }
  0x9d   :  { %v129_v20 = vpop.f32.mrf.mxu0 }
  0x9e   :  { %v1980_v29 = vadd.f32 %v129_v20, %v75_v2 }
  0xa0   :  { %2410 = vst [vmem:[#allocation23_spill] sm:$0xff] %v1980_v29 }
  0xa5   :  { %v132_v34 = vpop.f32.mrf.mxu0 }
  0xa6   :  { %v1982_v37 = vadd.f32 %v132_v34, %v75_v2 }
  0xa8   :  { %2411 = vst [vmem:[#allocation24_spill] sm:$0xff] %v1982_v37  ;;  %v1992_v37 = vperm.slane %v73_v0, 1 }
  0xaa   :  { %2416 = vst [vmem:[#allocation29_spill] sm:$0xff] %v1992_v37 }
  0xad   :  { %v135_v39 = vpop.f32.mrf.mxu0 }
  0xae   :  { %v1984_v43 = vadd.f32 %v135_v39, %v75_v2 }
  0xaf   :  { %v328_v44 = vpop.f32.mrf.mxu3 }
  0xb0   :  { %2412 = vst [vmem:[#allocation25_spill] sm:$0xff] %v1984_v43  ;;  %v371_v50 = vadd.f32 %v328_v44, %v124_v41  ;;  %v165_v41 = vadd.f32 %v164_v63, %v1992_v37 }
  0xb2   :  { %v1307_v55 = vmul.f32 -1.442695, %v371_v50 }
  0xb4   :  { %1333 = vpow2.f32 %v1307_v55 }
  0xb5   :  { %v138_v60 = vpop.f32.mrf.mxu0 }
  0xb6   :  { %v1986_v62 = vadd.f32 %v138_v60, %v75_v2 }
  0xb8   :  { %2413 = vst [vmem:[#allocation26_spill] sm:$0xff] %v1986_v62 }
  0xba   :  { %v1334_v33 = vpop.eup %1333 }
  0xbb   :  { %v375_v20 = vadd.f32 1.0, %v1334_v33  ;;  %v1998_v33 = vld [vmem:[%s2375_s4] ss:$0 sm:$0xff] }
  0xbd   :  { %v141_v4 = vpop.f32.mrf.mxu0  ;;  %1335 = vrcp.f32 %v375_v20  ;;  %vm381_vm2 = vweird.f32 %v375_v20 }
  0xbe   :  { %v1988_v12 = vadd.f32 %v141_v4, %v75_v2 }
  0xc0   :  { %2414 = vst [vmem:[#allocation27_spill] sm:$0xff] %v1988_v12  ;;  %v385_v12 = vand.u32 2147483647, %v375_v20 }
  0xc2   :  { %vm386_vm4 = vcmp.eq.f32.partialorder %v385_v12, 8.507059e+37 }
  0xc3   :  { %v1336_v39 = vpop.eup %1335 }
  0xc4   :  { %v377_v44 = vmul.f32 %v1336_v39, %v375_v20  ;;  %vm382_vm1 = vweird.f32 %v1336_v39 }
  0xc5   :  { %v144_v29 = vpop.f32.mrf.mxu0  ;;  %vm383_vm3 = vmor %vm381_vm2, %vm382_vm1 }
  0xc6   :  { %v1990_v34 = vadd.f32 %v144_v29, %v75_v2  ;;  %v378_v62 = vsub.f32 1.0, %v377_v44  ;;  %v2001_v44 = vperm.slane %v73_v0, 2 }
  0xc8   :  { %2415 = vst [vmem:[#allocation28_spill] sm:$0xff] %v1990_v34  ;;  %v379_v43 = vmul.f32 %v1336_v39, %v378_v62  ;;  %v387_v34 = vand.u32 2147483648, %v375_v20 }
  0xca   :  { %v380_v2 = vadd.f32 %v1336_v39, %v379_v43  ;;  %v388_v62 = vor.u32 1.1754944e-38, %v387_v34 }
  0xcc   :  { %v384_v37 = vsel %vm383_vm3, %v1336_v39, %v380_v2 }
  0xcd   :  { %v368_v4 = vpop.f32.mrf.mxu0 }
  0xcf   :  { %v348_v50 = vpop.f32.mrf.mxu3 }
  0xd0   :  { %v391_v60 = vadd.f32 %v348_v50, %v165_v41  ;;  %v411_v41 = vadd.f32 %v1998_v33, %v368_v4  ;;  %v205_v50 = vpop.f32.mrf.mxu2 }
  0xd1   :  { %v206_v43 = vadd.f32 %v205_v50, %v2001_v44 }
  0xd2   :  { %v1308_v55 = vmul.f32 -1.442695, %v391_v60  ;;  %v389_v60 = vsel %vm386_vm4, %v388_v62, %v384_v37 }
  0xd4   :  { %1337 = vpow2.f32 %v1308_v55  ;;  %v412_v55 = vmul.f32 %v411_v41, %v389_v60  ;;  %v2422_v60 = vld [vmem:[#allocation21_spill] sm:$0xff] }
  0xd6   :  { %v413_v31 = vadd.f32 %v412_v55, %v206_v43  ;;  %v167_v55 = vpop.f32.mrf.mxu1 }
  0xd8   :  { %v208_v43 = vpop.f32.mrf.mxu2 }
  0xda   :  { %v1338_v29 = vpop.eup %1337 }
  0xdb   :  { %v395_v63 = vadd.f32 1.0, %v1338_v29 }
  0xdd   :  { %1339 = vrcp.f32 %v395_v63  ;;  %v407_v20 = vand.u32 2147483648, %v395_v63  ;;  %v405_v39 = vand.u32 2147483647, %v395_v63  ;;  %vm401_vm6 = vweird.f32 %v395_v63 }
  0xde   :  { %1341 = vtanh.f32 %v413_v31  ;;  %v2417_v31 = vld [vmem:[#allocation16_spill] sm:$0xff] }
  0xdf   :  { %v408_v0 = vor.u32 1.1754944e-38, %v407_v20  ;;  %vm406_vm8 = vcmp.eq.f32.partialorder %v405_v39, 8.507059e+37  ;;  %v2057_v20 = vpop.f32.mrf.mxu1 }
  0xe0   :  { %2423 = vst [vmem:[#allocation30_spill] sm:$0xff] %v2057_v20 }
  0xe3   :  { %v1340_v46 = vpop.eup %1339 }
  0xe4   :  { %v397_v61 = vmul.f32 %v1340_v46, %v395_v63  ;;  %vm402_vm5 = vweird.f32 %v1340_v46  ;;  %v1342_v4 = vpop.eup %1341  ;;  %v2421_v63 = vld [vmem:[#allocation14_spill] sm:$0xff] }
  0xe5   :  { %vm403_vm7 = vmor %vm401_vm6, %vm402_vm5 }
  0xe6   :  { %v398_v42 = vsub.f32 1.0, %v397_v61  ;;  %v2420_v61 = vld [vmem:[#allocation17_spill] sm:$0xff] }
  0xe7   :  { %v2061_v39 = vpop.f32.mrf.mxu1 }
  0xe8   :  { %v399_v29 = vmul.f32 %v1340_v46, %v398_v42  ;;  %v2418_v42 = vld [vmem:[#allocation13_spill] sm:$0xff]  ;;  %2425 = vst [vmem:[#allocation32_spill] sm:$0xff] %v2061_v39  ;;  %v2435_v39 = vld [vmem:[#allocation22_spill] sm:$0xff] }
  0xea   :  { %v400_v2 = vadd.f32 %v1340_v46, %v399_v29  ;;  %v2059_v29 = vpop.f32.mrf.mxu2 }
  0xeb   :  { %2424 = vst [vmem:[#allocation31_spill] sm:$0xff] %v2059_v29 }
  0xec   :  { %v404_v34 = vsel %vm403_vm7, %v1340_v46, %v400_v2  ;;  %v2419_v46 = vld [vmem:[#allocation20_spill] sm:$0xff] }
  0xed   :  { %v409_v12 = vsel %vm406_vm8, %v408_v0, %v404_v34 }
  0xee   :  { %v415_v37 = vsub.f32 1.0, %v409_v12  ;;  %v417_v62 = vmul.f32 0.0, %v409_v12 }
  0xef   :  { %v2065_v0 = vpop.f32.mrf.mxu1 }
  0xf0   :  { %v416_v41 = vmul.f32 %v1342_v4, %v415_v37  ;;  %2427 = vst [vmem:[#allocation34_spill] sm:$0xff] %v2065_v0 }
  0xf2   :  { %v2004_v50 = vadd.f32 %v417_v62, %v416_v41  ;;  %v2063_v2 = vpop.f32.mrf.mxu2 }
  0xf3   :  { %2426 = vst [vmem:[#allocation33_spill] sm:$0xff] %v2063_v2 }
  0xf4   :  { %441 = vmatmul.f32.vlgmr.msrb.gmra.mxu1 %v2004_v50  ;;  %461 = vmatmul.f32.vlgmr.msrb.gmra.mxu2 %v2004_v50 }
  0xf5   :  { %481 = vmatmul.f32.vlgmr.msra.gmra.mxu3 %v2004_v50  ;;  %693 = vmatpush.msrb.mxu1 %v1618_v7 }
  0xf6   :  { %767 = vmatpush.msrb.mxu2 %v1597_v1  ;;  %787 = vmatpush.msra.mxu3 %v1716_v36 }
  0xf7   :  { %694 = vmatpush.msrb.mxu1 %v1624_v9  ;;  %v2069_v12 = vpop.f32.mrf.mxu1 }
  0xf8   :  { %768 = vmatpush.msrb.mxu2 %v1603_v3  ;;  %788 = vmatpush.msra.mxu3 %v1726_v40  ;;  %2429 = vst [vmem:[#allocation36_spill] sm:$0xff] %v2069_v12 }
  0xf9   :  { %695 = vmatpush.msrb.mxu1 %v1629_v11 }
  0xfa   :  { %769 = vmatpush.msrb.mxu2 %v1610_v5  ;;  %789 = vmatpush.msra.mxu3 %v1743_v45  ;;  %v2067_v34 = vpop.f32.mrf.mxu2 }
  0xfb   :  { %696 = vmatpush.msrb.mxu1 %v1640_v14  ;;  %2428 = vst [vmem:[#allocation35_spill] sm:$0xff] %v2067_v34 }
  0xfc   :  { %770 = vmatpush.msrb.mxu2 %v1615_v6  ;;  %790 = vmatpush.msra.mxu3 %v1753_v47 }
  0xfd   :  { %697 = vmatpush.msrb.mxu1 %v1647_v16 }
  0xfe   :  { %771 = vmatpush.msrb.mxu2 %v1620_v8  ;;  %791 = vmatpush.msra.mxu3 %v1758_v48 }
  0xff   :  { %698 = vmatpush.msrb.mxu1 %v1653_v18  ;;  %v2073_v4 = vpop.f32.mrf.mxu1 }
 0x100   :  { %772 = vmatpush.msrb.mxu2 %v1626_v10  ;;  %792 = vmatpush.msra.mxu3 %v1764_v49  ;;  %2431 = vst [vmem:[#allocation38_spill] sm:$0xff] %v2073_v4 }
 0x101   :  { %699 = vmatpush.msrb.mxu1 %v1666_v21 }
 0x102   :  { %773 = vmatpush.msrb.mxu2 %v1637_v13  ;;  %793 = vmatpush.msra.mxu3 %v1775_v51  ;;  %v2071_v37 = vpop.f32.mrf.mxu2 }
 0x103   :  { %700 = vmatpush.msrb.mxu1 %v1672_v23  ;;  %2430 = vst [vmem:[#allocation37_spill] sm:$0xff] %v2071_v37 }
 0x104   :  { %774 = vmatpush.msrb.mxu2 %v1645_v15  ;;  %794 = vmatpush.msra.mxu3 %v1784_v52 }
 0x105   :  { %701 = vmatpush.msrb.mxu1 %v1680_v25 }
 0x106   :  { %775 = vmatpush.msrb.mxu2 %v1651_v17  ;;  %795 = vmatpush.msra.mxu3 %v1790_v53 }
 0x107   :  { %702 = vmatpush.msrb.mxu1 %v1686_v27  ;;  %v2077_v62 = vpop.f32.mrf.mxu1 }
 0x108   :  { %776 = vmatpush.msrb.mxu2 %v1657_v19  ;;  %796 = vmatpush.msra.mxu3 %v1796_v54  ;;  %2433 = vst [vmem:[#allocation40_spill] sm:$0xff] %v2077_v62 }
 0x109   :  { %703 = vmatpush.msrb.mxu1 %v1697_v30 }
 0x10a   :  { %777 = vmatpush.msrb.mxu2 %v1668_v22  ;;  %797 = vmatpush.msra.mxu3 %v1807_v56  ;;  %v2075_v41 = vpop.f32.mrf.mxu2 }
 0x10b   :  { %704 = vmatpush.msrb.mxu1 %v1703_v32  ;;  %2432 = vst [vmem:[#allocation39_spill] sm:$0xff] %v2075_v41 }
 0x10c   :  { %778 = vmatpush.msrb.mxu2 %v1676_v24  ;;  %798 = vmatpush.msra.mxu3 %v1816_v57 }
 0x10d   :  { %705 = vmatpush.msrb.mxu1 %v1714_v35 }
 0x10e   :  { %779 = vmatpush.msrb.mxu2 %v1682_v26  ;;  %799 = vmatpush.msra.mxu3 %v1822_v58 }
 0x10f   :  { %706 = vmatpush.msrb.mxu1 %v1723_v38 }
 0x110   :  { %780 = vmatpush.msrb.mxu2 %v1688_v28  ;;  %800 = vmatpush.msra.mxu3 %v1828_v59 }
 0x111   :  { %707 = vmatpush.msrb.mxu1 %v2417_v31 }
 0x112   :  { %781 = vmatpush.msrb.mxu2 %v2418_v42  ;;  %801 = vmatpush.msra.mxu3 %v2419_v46  ;;  %v2079_v20 = vpop.f32.mrf.mxu2 }
 0x113   :  { %708 = vmatpush.msrb.mxu1 %v2420_v61  ;;  %2434 = vst [vmem:[#allocation41_spill] sm:$0xff] %v2079_v20 }
 0x114   :  { %782 = vmatpush.msrb.mxu2 %v2421_v63  ;;  %802 = vmatpush.msra.mxu3 %v2422_v60  ;;  %v2436_v63 = vld [vmem:[#allocation29_spill] sm:$0xff] }
 0x115   :  { %v168_v0 = vadd.f32 %v167_v55, %v2436_v63 }
 0x171   :  { %v442_v29 = vpop.f32.mrf.mxu1 }
 0x172   :  { %v485_v60 = vadd.f32 %v442_v29, %v2435_v39 }
 0x174   :  { %v1309_v2 = vmul.f32 -1.442695, %v485_v60 }
 0x176   :  { %1343 = vpow2.f32 %v1309_v2 }
 0x177   :  { %v462_v34 = vpop.f32.mrf.mxu2 }
 0x178   :  { %v505_v61 = vadd.f32 %v462_v34, %v168_v0  ;;  %v482_v55 = vpop.f32.mrf.mxu3 }
 0x179   :  { %v525_v34 = vadd.f32 %v1998_v33, %v482_v55 }
 0x17a   :  { %v1310_v12 = vmul.f32 -1.442695, %v505_v61 }
 0x17c   :  { %v1344_v46 = vpop.eup %1343  ;;  %1345 = vpow2.f32 %v1310_v12  ;;  %v209_v12 = vadd.f32 %v208_v43, %v2001_v44 }
 0x17d   :  { %v489_v37 = vadd.f32 1.0, %v1344_v46 }
 0x17f   :  { %1347 = vrcp.f32 %v489_v37  ;;  %v501_v31 = vand.u32 2147483648, %v489_v37  ;;  %v499_v60 = vand.u32 2147483647, %v489_v37  ;;  %vm495_vm10 = vweird.f32 %v489_v37 }
 0x181   :  { %v502_v61 = vor.u32 1.1754944e-38, %v501_v31  ;;  %vm500_vm12 = vcmp.eq.f32.partialorder %v499_v60, 8.507059e+37 }
 0x182   :  { %v1346_v4 = vpop.eup %1345 }
 0x183   :  { %v509_v41 = vadd.f32 1.0, %v1346_v4 }
 0x185   :  { %v1348_v42 = vpop.eup %1347  ;;  %1349 = vrcp.f32 %v509_v41  ;;  %v519_v28 = vand.u32 2147483647, %v509_v41  ;;  %vm515_vm14 = vweird.f32 %v509_v41 }
 0x186   :  { %v491_v62 = vmul.f32 %v1348_v42, %v489_v37  ;;  %vm496_vm9 = vweird.f32 %v1348_v42 }
 0x187   :  { %vm497_vm11 = vmor %vm495_vm10, %vm496_vm9  ;;  %vm520_vm0 = vcmp.eq.f32.partialorder %v519_v28, 8.507059e+37 }
 0x188   :  { %v492_v20 = vsub.f32 1.0, %v491_v62 }
 0x18a   :  { %v493_v59 = vmul.f32 %v1348_v42, %v492_v20  ;;  %v521_v20 = vand.u32 2147483648, %v509_v41 }
 0x18b   :  { %v1350_v29 = vpop.eup %1349 }
 0x18c   :  { %v511_v39 = vmul.f32 %v1350_v29, %v509_v41  ;;  %v494_v2 = vadd.f32 %v1348_v42, %v493_v59  ;;  %vm516_vm13 = vweird.f32 %v1350_v29  ;;  %v522_v31 = vor.u32 1.1754944e-38, %v521_v20  ;;  %v2450_v20 = vld [vmem:[#allocation31_spill] sm:$0xff] }
 0x18d   :  { %vm517_vm15 = vmor %vm515_vm14, %vm516_vm13 }
 0x18e   :  { %v512_v0 = vsub.f32 1.0, %v511_v39  ;;  %v498_v46 = vsel %vm497_vm11, %v1348_v42, %v494_v2 }
 0x18f   :  { %v503_v4 = vsel %vm500_vm12, %v502_v61, %v498_v46 }
 0x190   :  { %v513_v62 = vmul.f32 %v1350_v29, %v512_v0  ;;  %v526_v63 = vmul.f32 %v525_v34, %v503_v4 }
 0x192   :  { %v527_v38 = vadd.f32 %v526_v63, %v209_v12  ;;  %v514_v58 = vadd.f32 %v1350_v29, %v513_v62 }
 0x194   :  { %1351 = vtanh.f32 %v527_v38  ;;  %v518_v59 = vsel %vm517_vm15, %v1350_v29, %v514_v58 }
 0x195   :  { %v523_v42 = vsel %vm520_vm0, %v522_v31, %v518_v59  ;;  %v212_v59 = vadd.f32 %v2450_v20, %v2001_v44 }
 0x196   :  { %v529_v37 = vsub.f32 1.0, %v523_v42  ;;  %v531_v43 = vmul.f32 %v523_v42, %v2004_v50 }
 0x19a   :  { %v1352_v60 = vpop.eup %1351 }
 0x19b   :  { %v530_v55 = vmul.f32 %v1352_v60, %v529_v37 }
 0x19d   :  { %v2086_v39 = vadd.f32 %v531_v43, %v530_v55 }
 0x19f   :  { %555 = vmatmul.f32.vlgmr.msra.gmra.mxu0 %v2086_v39  ;;  %575 = vmatmul.f32.vlgmr.msra.gmra.mxu1 %v2086_v39 }
 0x1a0   :  { %595 = vmatmul.f32.vlgmr.msra.gmra.mxu2 %v2086_v39  ;;  %807 = vmatpush.msra.mxu0 %v1618_v7  ;;  %v2441_v7 = vld [vmem:[#allocation16_spill] sm:$0xff] }
 0x1a1   :  { %881 = vmatpush.msra.mxu1 %v1597_v1  ;;  %901 = vmatpush.msra.mxu2 %v1716_v36  ;;  %v2437_v1 = vld [vmem:[#allocation18_spill] sm:$0xff] }
 0x1a2   :  { %808 = vmatpush.msra.mxu0 %v1624_v9  ;;  %v2443_v9 = vld [vmem:[#allocation20_spill] sm:$0xff] }
 0x1a3   :  { %882 = vmatpush.msra.mxu1 %v1603_v3  ;;  %902 = vmatpush.msra.mxu2 %v1726_v40  ;;  %v2438_v3 = vld [vmem:[#allocation15_spill] sm:$0xff] }
 0x1a4   :  { %809 = vmatpush.msra.mxu0 %v1629_v11  ;;  %v2445_v11 = vld [vmem:[#allocation14_spill] sm:$0xff] }
 0x1a5   :  { %883 = vmatpush.msra.mxu1 %v1610_v5  ;;  %903 = vmatpush.msra.mxu2 %v1743_v45  ;;  %v2439_v5 = vld [vmem:[#allocation12_spill] sm:$0xff] }
 0x1a6   :  { %810 = vmatpush.msra.mxu0 %v1640_v14  ;;  %v2447_v14 = vld [vmem:[#allocation29_spill] sm:$0xff] }
 0x1a7   :  { %884 = vmatpush.msra.mxu1 %v1615_v6  ;;  %904 = vmatpush.msra.mxu2 %v1753_v47  ;;  %v2440_v6 = vld [vmem:[#allocation19_spill] sm:$0xff] }
 0x1a8   :  { %811 = vmatpush.msra.mxu0 %v1647_v16 }
 0x1a9   :  { %885 = vmatpush.msra.mxu1 %v1620_v8  ;;  %905 = vmatpush.msra.mxu2 %v1758_v48  ;;  %v2442_v8 = vld [vmem:[#allocation13_spill] sm:$0xff] }
 0x1aa   :  { %812 = vmatpush.msra.mxu0 %v1653_v18 }
 0x1ab   :  { %886 = vmatpush.msra.mxu1 %v1626_v10  ;;  %906 = vmatpush.msra.mxu2 %v1764_v49  ;;  %v2444_v10 = vld [vmem:[#allocation17_spill] sm:$0xff] }
 0x1ac   :  { %813 = vmatpush.msra.mxu0 %v1666_v21 }
 0x1ad   :  { %887 = vmatpush.msra.mxu1 %v1637_v13  ;;  %907 = vmatpush.msra.mxu2 %v1775_v51  ;;  %v2446_v13 = vld [vmem:[#allocation21_spill] sm:$0xff] }
 0x1ae   :  { %814 = vmatpush.msra.mxu0 %v1672_v23 }
 0x1af   :  { %888 = vmatpush.msra.mxu1 %v1645_v15  ;;  %908 = vmatpush.msra.mxu2 %v1784_v52  ;;  %v2448_v15 = vld [vmem:[#allocation30_spill] sm:$0xff] }
 0x1b0   :  { %815 = vmatpush.msra.mxu0 %v1680_v25  ;;  %v171_v16 = vadd.f32 %v2448_v15, %v2447_v14  ;;  %v2151_v15 = vld [vmem:[#allocation3 + $0x178] sm:$0xff] }
 0x1b1   :  { %889 = vmatpush.msra.mxu1 %v1651_v17  ;;  %909 = vmatpush.msra.mxu2 %v1790_v53 }
 0x1b2   :  { %816 = vmatpush.msra.mxu0 %v1686_v27 }
 0x1b3   :  { %890 = vmatpush.msra.mxu1 %v1657_v19  ;;  %910 = vmatpush.msra.mxu2 %v1796_v54  ;;  %v2449_v19 = vld [vmem:[#allocation23_spill] sm:$0xff] }
 0x1b4   :  { %817 = vmatpush.msra.mxu0 %v1697_v30 }
 0x1b5   :  { %891 = vmatpush.msra.mxu1 %v1668_v22  ;;  %911 = vmatpush.msra.mxu2 %v1807_v56 }
 0x1b6   :  { %818 = vmatpush.msra.mxu0 %v1703_v32 }
 0x1b7   :  { %892 = vmatpush.msra.mxu1 %v1676_v24  ;;  %912 = vmatpush.msra.mxu2 %v1816_v57 }
 0x1b8   :  { %819 = vmatpush.msra.mxu0 %v1714_v35 }
 0x1b9   :  { %893 = vmatpush.msra.mxu1 %v1682_v26  ;;  %913 = vmatpush.msra.mxu2 %v2437_v1 }
 0x1ba   :  { %820 = vmatpush.msra.mxu0 %v2438_v3 }
 0x1bb   :  { %894 = vmatpush.msra.mxu1 %v2439_v5  ;;  %914 = vmatpush.msra.mxu2 %v2440_v6 }
 0x1bc   :  { %821 = vmatpush.msra.mxu0 %v2441_v7 }
 0x1bd   :  { %895 = vmatpush.msra.mxu1 %v2442_v8  ;;  %915 = vmatpush.msra.mxu2 %v2443_v9 }
 0x1be   :  { %822 = vmatpush.msra.mxu0 %v2444_v10 }
 0x1bf   :  { %896 = vmatpush.msra.mxu1 %v2445_v11  ;;  %916 = vmatpush.msra.mxu2 %v2446_v13 }
 0x21c   :  { %v556_v17 = vpop.f32.mrf.mxu0  ;;  %v576_v18 = vpop.f32.mrf.mxu1 }
 0x21d   :  { %v599_v21 = vadd.f32 %v556_v17, %v2449_v19  ;;  %v619_v22 = vadd.f32 %v576_v18, %v171_v16  ;;  %v2154_v16 = vld [vmem:[#allocation3 + $0x168] sm:$0xff]  ;;  %v2158_v17 = vld [vmem:[#allocation3 + $0x160] sm:$0xff]  ;;  %v2168_v19 = vld [vmem:[#allocation3 + $0x138] sm:$0xff] }
 0x21e   :  { %v2165_v18 = vld [vmem:[#allocation3 + $0x148] sm:$0xff] }
 0x21f   :  { %v1311_v23 = vmul.f32 -1.442695, %v599_v21  ;;  %v1312_v24 = vmul.f32 -1.442695, %v619_v22  ;;  %v2175_v21 = vld [vmem:[#allocation3 + $0x120] sm:$0xff]  ;;  %v2182_v22 = vld [vmem:[#allocation3 + $0x108] sm:$0xff] }
 0x221   :  { %1353 = vpow2.f32 %v1311_v23  ;;  %v2189_v23 = vld [vmem:[#allocation3 + $0xf0] sm:$0xff] }
 0x222   :  { %1355 = vpow2.f32 %v1312_v24  ;;  %v2196_v24 = vld [vmem:[#allocation3 + $0xd8] sm:$0xff] }
 0x223   :  { %v596_v61 = vpop.f32.mrf.mxu2 }
 0x224   :  { %v639_v12 = vadd.f32 %v1998_v33, %v596_v61  ;;  %v2452_v61 = vld [vmem:[#allocation24_spill] sm:$0xff] }
 0x227   :  { %v1354_v25 = vpop.eup %1353 }
 0x228   :  { %v1356_v26 = vpop.eup %1355  ;;  %v603_v27 = vadd.f32 1.0, %v1354_v25  ;;  %v2203_v25 = vld [vmem:[#allocation3 + $0xc0] sm:$0xff] }
 0x229   :  { %v623_v28 = vadd.f32 1.0, %v1356_v26  ;;  %v2210_v26 = vld [vmem:[#allocation3 + $0xa8] sm:$0xff] }
 0x22a   :  { %1357 = vrcp.f32 %v603_v27  ;;  %v615_v63 = vand.u32 2147483648, %v603_v27  ;;  %v613_v29 = vand.u32 2147483647, %v603_v27  ;;  %vm609_vm2 = vweird.f32 %v603_v27 }
 0x22b   :  { %1359 = vrcp.f32 %v623_v28  ;;  %v635_v42 = vand.u32 2147483648, %v623_v28  ;;  %vm629_vm6 = vweird.f32 %v623_v28  ;;  %v633_v37 = vand.u32 2147483647, %v623_v28 }
 0x22c   :  { %v616_v46 = vor.u32 1.1754944e-38, %v615_v63  ;;  %vm614_vm4 = vcmp.eq.f32.partialorder %v613_v29, 8.507059e+37 }
 0x22d   :  { %v636_v43 = vor.u32 1.1754944e-38, %v635_v42  ;;  %vm634_vm8 = vcmp.eq.f32.partialorder %v633_v37, 8.507059e+37 }
 0x230   :  { %v1358_v30 = vpop.eup %1357 }
 0x231   :  { %v1360_v32 = vpop.eup %1359  ;;  %v605_v35 = vmul.f32 %v1358_v30, %v603_v27  ;;  %vm610_vm1 = vweird.f32 %v1358_v30  ;;  %v2217_v27 = vld [vmem:[#allocation3 + $0x90] sm:$0xff] }
 0x232   :  { %v625_v38 = vmul.f32 %v1360_v32, %v623_v28  ;;  %vm611_vm3 = vmor %vm609_vm2, %vm610_vm1  ;;  %vm630_vm5 = vweird.f32 %v1360_v32  ;;  %v2224_v28 = vld [vmem:[#allocation3 + $0x78] sm:$0xff] }
 0x233   :  { %v606_v58 = vsub.f32 1.0, %v605_v35  ;;  %vm631_vm7 = vmor %vm629_vm6, %vm630_vm5  ;;  %v2245_v35 = vld [vmem:[#allocation3 + $0x30] sm:$0xff] }
 0x234   :  { %v626_v50 = vsub.f32 1.0, %v625_v38  ;;  %v2252_v38 = vld [vmem:[#allocation3 + $0x18] sm:$0xff] }
 0x235   :  { %v607_v41 = vmul.f32 %v1358_v30, %v606_v58  ;;  %v2259_v58 = vld [vmem:[#allocation3] sm:$0xff] }
 0x236   :  { %v627_v2 = vmul.f32 %v1360_v32, %v626_v50 }
 0x237   :  { %v608_v0 = vadd.f32 %v1358_v30, %v607_v41 }
 0x238   :  { %v628_v62 = vadd.f32 %v1360_v32, %v627_v2 }
 0x239   :  { %v612_v34 = vsel %vm611_vm3, %v1358_v30, %v608_v0  ;;  %v2231_v30 = vld [vmem:[#allocation3 + $0x60] sm:$0xff] }
 0x23a   :  { %v617_v4 = vsel %vm614_vm4, %v616_v46, %v612_v34  ;;  %v632_v55 = vsel %vm631_vm7, %v1360_v32, %v628_v62  ;;  %v2238_v32 = vld [vmem:[#allocation3 + $0x48] sm:$0xff] }
 0x23b   :  { %v640_v31 = vmul.f32 %v639_v12, %v617_v4  ;;  %v637_v3 = vsel %vm634_vm8, %v636_v43, %v632_v55 }
 0x23c   :  { %v643_v5 = vsub.f32 1.0, %v637_v3  ;;  %v645_v10 = vmul.f32 %v637_v3, %v2086_v39  ;;  %v2161_v39 = vld [vmem:[#allocation3 + $0x150] sm:$0xff] }
 0x23d   :  { %v641_v60 = vadd.f32 %v640_v31, %v212_v59 }
 0x23f   :  { %1361 = vtanh.f32 %v641_v60 }
 0x245   :  { %v1362_v7 = vpop.eup %1361 }
 0x246   :  { %v644_v8 = vmul.f32 %v1362_v7, %v643_v5 }
 0x248   :  { %v2146_v11 = vadd.f32 %v645_v10, %v644_v8 }
 0x24a   :  { %669 = vmatmul.f32.vlgmr.msrb.gmra.mxu3 %v2146_v11  ;;  %689 = vmatmul.f32.vlgmr.msrb.gmra.mxu0 %v2146_v11 }
 0x24b   :  { %709 = vmatmul.f32.vlgmr.msrb.gmra.mxu1 %v2146_v11  ;;  %921 = vmatpush.msrb.mxu3 %v2151_v15 }
 0x24c   :  { %995 = vmatpush.msrb.mxu0 %v2154_v16  ;;  %1015 = vmatpush.msrb.mxu1 %v1716_v36  ;;  %v2172_v36 = vld [vmem:[#allocation3 + $0x130] sm:$0xff] }
 0x24d   :  { %922 = vmatpush.msrb.mxu3 %v2158_v17 }
 0x24e   :  { %996 = vmatpush.msrb.mxu0 %v2161_v39  ;;  %1016 = vmatpush.msrb.mxu1 %v1726_v40  ;;  %v2179_v40 = vld [vmem:[#allocation3 + $0x118] sm:$0xff] }
 0x24f   :  { %923 = vmatpush.msrb.mxu3 %v2165_v18 }
 0x250   :  { %997 = vmatpush.msrb.mxu0 %v2168_v19  ;;  %1017 = vmatpush.msrb.mxu1 %v1743_v45  ;;  %v2186_v45 = vld [vmem:[#allocation3 + $0x100] sm:$0xff] }
 0x251   :  { %924 = vmatpush.msrb.mxu3 %v2172_v36 }
 0x252   :  { %998 = vmatpush.msrb.mxu0 %v2175_v21  ;;  %1018 = vmatpush.msrb.mxu1 %v1753_v47  ;;  %v2193_v47 = vld [vmem:[#allocation3 + $0xe8] sm:$0xff] }
 0x253   :  { %925 = vmatpush.msrb.mxu3 %v2179_v40 }
 0x254   :  { %999 = vmatpush.msrb.mxu0 %v2182_v22  ;;  %1019 = vmatpush.msrb.mxu1 %v1758_v48  ;;  %v2200_v48 = vld [vmem:[#allocation3 + $0xd0] sm:$0xff] }
 0x255   :  { %926 = vmatpush.msrb.mxu3 %v2186_v45 }
 0x256   :  { %1000 = vmatpush.msrb.mxu0 %v2189_v23  ;;  %1020 = vmatpush.msrb.mxu1 %v1764_v49  ;;  %v2207_v49 = vld [vmem:[#allocation3 + $0xb8] sm:$0xff] }
 0x257   :  { %927 = vmatpush.msrb.mxu3 %v2193_v47 }
 0x258   :  { %1001 = vmatpush.msrb.mxu0 %v2196_v24  ;;  %1021 = vmatpush.msrb.mxu1 %v1775_v51  ;;  %v2214_v51 = vld [vmem:[#allocation3 + $0xa0] sm:$0xff] }
 0x259   :  { %928 = vmatpush.msrb.mxu3 %v2200_v48 }
 0x25a   :  { %1002 = vmatpush.msrb.mxu0 %v2203_v25  ;;  %1022 = vmatpush.msrb.mxu1 %v1784_v52  ;;  %v2221_v52 = vld [vmem:[#allocation3 + $0x88] sm:$0xff] }
 0x25b   :  { %929 = vmatpush.msrb.mxu3 %v2207_v49 }
 0x25c   :  { %1003 = vmatpush.msrb.mxu0 %v2210_v26  ;;  %1023 = vmatpush.msrb.mxu1 %v1790_v53  ;;  %v2228_v53 = vld [vmem:[#allocation3 + $0x70] sm:$0xff] }
 0x25d   :  { %930 = vmatpush.msrb.mxu3 %v2214_v51 }
 0x25e   :  { %1004 = vmatpush.msrb.mxu0 %v2217_v27  ;;  %1024 = vmatpush.msrb.mxu1 %v1796_v54  ;;  %v2235_v54 = vld [vmem:[#allocation3 + $0x58] sm:$0xff] }
 0x25f   :  { %931 = vmatpush.msrb.mxu3 %v2221_v52 }
 0x260   :  { %1005 = vmatpush.msrb.mxu0 %v2224_v28  ;;  %1025 = vmatpush.msrb.mxu1 %v1807_v56  ;;  %v2242_v56 = vld [vmem:[#allocation3 + $0x40] sm:$0xff] }
 0x261   :  { %932 = vmatpush.msrb.mxu3 %v2228_v53 }
 0x262   :  { %1006 = vmatpush.msrb.mxu0 %v2231_v30  ;;  %1026 = vmatpush.msrb.mxu1 %v1816_v57  ;;  %v2249_v57 = vld [vmem:[#allocation3 + $0x28] sm:$0xff] }
 0x263   :  { %933 = vmatpush.msrb.mxu3 %v2235_v54 }
 0x264   :  { %1007 = vmatpush.msrb.mxu0 %v2238_v32  ;;  %1027 = vmatpush.msrb.mxu1 %v2437_v1  ;;  %v2256_v1 = vld [vmem:[#allocation3 + $0x10] sm:$0xff] }
 0x265   :  { %934 = vmatpush.msrb.mxu3 %v2242_v56 }
 0x266   :  { %1008 = vmatpush.msrb.mxu0 %v2245_v35  ;;  %1028 = vmatpush.msrb.mxu1 %v2440_v6  ;;  %v2451_v6 = vld [vmem:[#allocation32_spill] sm:$0xff] }
 0x267   :  { %935 = vmatpush.msrb.mxu3 %v2249_v57  ;;  %v174_v50 = vadd.f32 %v2451_v6, %v2447_v14 }
 0x268   :  { %1009 = vmatpush.msrb.mxu0 %v2252_v38  ;;  %1029 = vmatpush.msrb.mxu1 %v2443_v9 }
 0x269   :  { %936 = vmatpush.msrb.mxu3 %v2256_v1 }
 0x26a   :  { %1010 = vmatpush.msrb.mxu0 %v2259_v58  ;;  %1030 = vmatpush.msrb.mxu1 %v2446_v13 }
 0x2c7   :  { %v690_v63 = vpop.f32.mrf.mxu0 }
 0x2c8   :  { %v733_v41 = vadd.f32 %v690_v63, %v174_v50  ;;  %v710_v3 = vpop.f32.mrf.mxu1  ;;  %v2453_v63 = vld [vmem:[#allocation33_spill] sm:$0xff] }
 0x2c9   :  { %v753_v8 = vadd.f32 %v1998_v33, %v710_v3 }
 0x2ca   :  { %v1314_v29 = vmul.f32 -1.442695, %v733_v41  ;;  %v215_v41 = vadd.f32 %v2453_v63, %v2001_v44 }
 0x2cc   :  { %1363 = vpow2.f32 %v1314_v29 }
 0x2cd   :  { %v670_v2 = vpop.f32.mrf.mxu3 }
 0x2ce   :  { %v713_v9 = vadd.f32 %v670_v2, %v2452_v61 }
 0x2d0   :  { %v1313_v0 = vmul.f32 -1.442695, %v713_v9 }
 0x2d2   :  { %v1364_v46 = vpop.eup %1363  ;;  %1365 = vpow2.f32 %v1313_v0 }
 0x2d3   :  { %v737_v34 = vadd.f32 1.0, %v1364_v46 }
 0x2d5   :  { %1367 = vrcp.f32 %v737_v34  ;;  %v749_v29 = vand.u32 2147483648, %v737_v34  ;;  %vm743_vm14 = vweird.f32 %v737_v34  ;;  %v747_v61 = vand.u32 2147483647, %v737_v34 }
 0x2d7   :  { %v750_v46 = vor.u32 1.1754944e-38, %v749_v29  ;;  %vm748_vm0 = vcmp.eq.f32.partialorder %v747_v61, 8.507059e+37 }
 0x2d8   :  { %v1366_v12 = vpop.eup %1365 }
 0x2d9   :  { %v717_v4 = vadd.f32 1.0, %v1366_v12 }
 0x2db   :  { %1369 = vrcp.f32 %v717_v4  ;;  %v1368_v62 = vpop.eup %1367  ;;  %v729_v37 = vand.u32 2147483648, %v717_v4  ;;  %v727_v55 = vand.u32 2147483647, %v717_v4  ;;  %vm723_vm10 = vweird.f32 %v717_v4 }
 0x2dc   :  { %v739_v13 = vmul.f32 %v1368_v62, %v737_v34  ;;  %vm744_vm13 = vweird.f32 %v1368_v62  ;;  %v1445_v34 = vld [vmem:[#allocation3 + $0x170] sm:$0xff] }
 0x2dd   :  { %v730_v7 = vor.u32 1.1754944e-38, %v729_v37  ;;  %vm728_vm12 = vcmp.eq.f32.partialorder %v727_v55, 8.507059e+37  ;;  %vm745_vm15 = vmor %vm743_vm14, %vm744_vm13 }
 0x2de   :  { %v740_v31 = vsub.f32 1.0, %v739_v13 }
 0x2e0   :  { %v741_v43 = vmul.f32 %v1368_v62, %v740_v31 }
 0x2e1   :  { %v1370_v20 = vpop.eup %1369 }
 0x2e2   :  { %v719_v59 = vmul.f32 %v1370_v20, %v717_v4  ;;  %vm724_vm9 = vweird.f32 %v1370_v20  ;;  %v742_v50 = vadd.f32 %v1368_v62, %v741_v43 }
 0x2e3   :  { %vm725_vm11 = vmor %vm723_vm10, %vm724_vm9 }
 0x2e4   :  { %v720_v42 = vsub.f32 1.0, %v719_v59  ;;  %v746_v0 = vsel %vm745_vm15, %v1368_v62, %v742_v50  ;;  %v1446_v62 = vld [vmem:[#allocation3 + $0x158] sm:$0xff] }
 0x2e5   :  { %v751_v12 = vsel %vm748_vm0, %v750_v46, %v746_v0 }
 0x2e6   :  { %v721_v60 = vmul.f32 %v1370_v20, %v720_v42  ;;  %v757_v4 = vsub.f32 1.0, %v751_v12  ;;  %v759_v59 = vmul.f32 %v751_v12, %v2146_v11  ;;  %v1447_v11 = vld [vmem:[#allocation3 + $0x140] sm:$0xff]  ;;  %v1448_v42 = vld [vmem:[#allocation3 + $0x128] sm:$0xff] }
 0x2e8   :  { %v722_v5 = vadd.f32 %v1370_v20, %v721_v60 }
 0x2ea   :  { %v726_v10 = vsel %vm725_vm11, %v1370_v20, %v722_v5 }
 0x2eb   :  { %v731_v6 = vsel %vm728_vm12, %v730_v7, %v726_v10 }
 0x2ec   :  { %v754_v2 = vmul.f32 %v753_v8, %v731_v6 }
 0x2ee   :  { %v755_v9 = vadd.f32 %v754_v2, %v215_v41 }
 0x2f0   :  { %1371 = vtanh.f32 %v755_v9 }
 0x2f6   :  { %v1372_v13 = vpop.eup %1371 }
 0x2f7   :  { %v758_v20 = vmul.f32 %v1372_v13, %v757_v4 }
 0x2f9   :  { %v2270_v31 = vadd.f32 %v759_v59, %v758_v20 }
 0x2fb   :  { %783 = vmatmul.f32.vlgmr.msrb.gmra.mxu2 %v2270_v31  ;;  %803 = vmatmul.f32.vlgmr.msra.gmra.mxu3 %v2270_v31 }
 0x2fc   :  { %823 = vmatmul.f32.vlgmr.msra.gmra.mxu0 %v2270_v31  ;;  %1035 = vmatpush.msrb.mxu2 %v2151_v15 }
 0x2fd   :  { %1109 = vmatpush.msra.mxu3 %v2154_v16  ;;  %1129 = vmatpush.msra.mxu0 %v1445_v34  ;;  %v1449_v16 = vld [vmem:[#allocation3 + $0x110] sm:$0xff] }
 0x2fe   :  { %1036 = vmatpush.msrb.mxu2 %v2158_v17 }
 0x2ff   :  { %1110 = vmatpush.msra.mxu3 %v2161_v39  ;;  %1130 = vmatpush.msra.mxu0 %v1446_v62  ;;  %v1450_v39 = vld [vmem:[#allocation3 + $0xf8] sm:$0xff] }
 0x300   :  { %1037 = vmatpush.msrb.mxu2 %v2165_v18 }
 0x301   :  { %1111 = vmatpush.msra.mxu3 %v2168_v19  ;;  %1131 = vmatpush.msra.mxu0 %v1447_v11  ;;  %v1451_v19 = vld [vmem:[#allocation3 + $0xe0] sm:$0xff] }
 0x302   :  { %1038 = vmatpush.msrb.mxu2 %v2172_v36  ;;  %v2456_v11 = vld [vmem:[#allocation35_spill] sm:$0xff] }
 0x303   :  { %1112 = vmatpush.msra.mxu3 %v2175_v21  ;;  %1132 = vmatpush.msra.mxu0 %v1448_v42  ;;  %v1452_v21 = vld [vmem:[#allocation3 + $0xc8] sm:$0xff]  ;;  %v218_v42 = vadd.f32 %v2456_v11, %v2001_v44 }
 0x304   :  { %1039 = vmatpush.msrb.mxu2 %v2179_v40 }
 0x305   :  { %1113 = vmatpush.msra.mxu3 %v2182_v22  ;;  %1133 = vmatpush.msra.mxu0 %v1449_v16  ;;  %v1453_v22 = vld [vmem:[#allocation3 + $0xb0] sm:$0xff] }
 0x306   :  { %1040 = vmatpush.msrb.mxu2 %v2186_v45 }
 0x307   :  { %1114 = vmatpush.msra.mxu3 %v2189_v23  ;;  %1134 = vmatpush.msra.mxu0 %v1450_v39  ;;  %v1454_v23 = vld [vmem:[#allocation3 + $0x98] sm:$0xff] }
 0x308   :  { %1041 = vmatpush.msrb.mxu2 %v2193_v47 }
 0x309   :  { %1115 = vmatpush.msra.mxu3 %v2196_v24  ;;  %1135 = vmatpush.msra.mxu0 %v1451_v19  ;;  %v1455_v24 = vld [vmem:[#allocation3 + $0x80] sm:$0xff] }
 0x30a   :  { %1042 = vmatpush.msrb.mxu2 %v2200_v48 }
 0x30b   :  { %1116 = vmatpush.msra.mxu3 %v2203_v25  ;;  %1136 = vmatpush.msra.mxu0 %v1452_v21  ;;  %v1456_v25 = vld [vmem:[#allocation3 + $0x68] sm:$0xff] }
 0x30c   :  { %1043 = vmatpush.msrb.mxu2 %v2207_v49 }
 0x30d   :  { %1117 = vmatpush.msra.mxu3 %v2210_v26  ;;  %1137 = vmatpush.msra.mxu0 %v1453_v22  ;;  %v1457_v26 = vld [vmem:[#allocation3 + $0x50] sm:$0xff] }
 0x30e   :  { %1044 = vmatpush.msrb.mxu2 %v2214_v51 }
 0x30f   :  { %1118 = vmatpush.msra.mxu3 %v2217_v27  ;;  %1138 = vmatpush.msra.mxu0 %v1454_v23  ;;  %v1458_v27 = vld [vmem:[#allocation3 + $0x38] sm:$0xff] }
 0x310   :  { %1045 = vmatpush.msrb.mxu2 %v2221_v52 }
 0x311   :  { %1119 = vmatpush.msra.mxu3 %v2224_v28  ;;  %1139 = vmatpush.msra.mxu0 %v1455_v24  ;;  %v1459_v28 = vld [vmem:[#allocation3 + $0x20] sm:$0xff] }
 0x312   :  { %1046 = vmatpush.msrb.mxu2 %v2228_v53 }
 0x313   :  { %1120 = vmatpush.msra.mxu3 %v2231_v30  ;;  %1140 = vmatpush.msra.mxu0 %v1456_v25  ;;  %v1460_v30 = vld [vmem:[#allocation3 + $0x8] sm:$0xff] }
 0x314   :  { %1047 = vmatpush.msrb.mxu2 %v2235_v54 }
 0x315   :  { %1121 = vmatpush.msra.mxu3 %v2238_v32  ;;  %1141 = vmatpush.msra.mxu0 %v1457_v26  ;;  %v2454_v32 = vld [vmem:[#allocation34_spill] sm:$0xff] }
 0x316   :  { %1048 = vmatpush.msrb.mxu2 %v2242_v56  ;;  %v177_v37 = vadd.f32 %v2454_v32, %v2447_v14 }
 0x317   :  { %1122 = vmatpush.msra.mxu3 %v2245_v35  ;;  %1142 = vmatpush.msra.mxu0 %v1458_v27  ;;  %v2455_v35 = vld [vmem:[#allocation25_spill] sm:$0xff] }
 0x318   :  { %1049 = vmatpush.msrb.mxu2 %v2249_v57 }
 0x319   :  { %1123 = vmatpush.msra.mxu3 %v2252_v38  ;;  %1143 = vmatpush.msra.mxu0 %v1459_v28 }
 0x31a   :  { %1050 = vmatpush.msrb.mxu2 %v2256_v1 }
 0x31b   :  { %1124 = vmatpush.msra.mxu3 %v2259_v58  ;;  %1144 = vmatpush.msra.mxu0 %v1460_v30 }
 0x379   :  { %v824_v46 = vpop.f32.mrf.mxu0 }
 0x37a   :  { %v867_v20 = vadd.f32 %v1998_v33, %v824_v46 }
 0x37e   :  { %v784_v60 = vpop.f32.mrf.mxu2  ;;  %v804_v55 = vpop.f32.mrf.mxu3 }
 0x37f   :  { %v827_v43 = vadd.f32 %v784_v60, %v2455_v35  ;;  %v847_v3 = vadd.f32 %v804_v55, %v177_v37 }
 0x381   :  { %v1315_v5 = vmul.f32 -1.442695, %v827_v43  ;;  %v1316_v7 = vmul.f32 -1.442695, %v847_v3 }
 0x383   :  { %1373 = vpow2.f32 %v1315_v5 }
 0x384   :  { %1375 = vpow2.f32 %v1316_v7  ;;  %v2341_v7 = vld [vmem:[%s2375_s4] ss:$0 sm:$0xff] }
 0x389   :  { %v1374_v38 = vpop.eup %1373 }
 0x38a   :  { %v1376_v8 = vpop.eup %1375  ;;  %v831_v10 = vadd.f32 1.0, %v1374_v38 }
 0x38b   :  { %v851_v6 = vadd.f32 1.0, %v1376_v8  ;;  %v2459_v8 = vld [vmem:[#allocation37_spill] sm:$0xff] }
 0x38c   :  { %1377 = vrcp.f32 %v831_v10  ;;  %v843_v2 = vand.u32 2147483648, %v831_v10  ;;  %v841_v0 = vand.u32 2147483647, %v831_v10  ;;  %vm837_vm2 = vweird.f32 %v831_v10 }
 0x38d   :  { %1379 = vrcp.f32 %v851_v6  ;;  %v863_v16 = vand.u32 2147483648, %v851_v6  ;;  %vm857_vm6 = vweird.f32 %v851_v6  ;;  %v861_v19 = vand.u32 2147483647, %v851_v6 }
 0x38e   :  { %v844_v13 = vor.u32 1.1754944e-38, %v843_v2  ;;  %vm842_vm4 = vcmp.eq.f32.partialorder %v841_v0, 8.507059e+37 }
 0x38f   :  { %v864_v23 = vor.u32 1.1754944e-38, %v863_v16  ;;  %vm862_vm8 = vcmp.eq.f32.partialorder %v861_v19, 8.507059e+37 }
 0x392   :  { %v1378_v58 = vpop.eup %1377 }
 0x393   :  { %v1380_v50 = vpop.eup %1379  ;;  %v833_v63 = vmul.f32 %v1378_v58, %v831_v10  ;;  %vm838_vm1 = vweird.f32 %v1378_v58  ;;  %v221_v10 = vadd.f32 %v2459_v8, %v2001_v44  ;;  %v1232_v8 = vld [vmem:[#allocation6 + $0x78] sm:$0xff] }
 0x394   :  { %v853_v41 = vmul.f32 %v1380_v50, %v851_v6  ;;  %vm839_vm3 = vmor %vm837_vm2, %vm838_vm1  ;;  %vm858_vm5 = vweird.f32 %v1380_v50 }
 0x395   :  { %v834_v29 = vsub.f32 1.0, %v833_v63  ;;  %vm859_vm7 = vmor %vm857_vm6, %vm858_vm5 }
 0x396   :  { %v854_v61 = vsub.f32 1.0, %v853_v41 }
 0x397   :  { %v835_v9 = vmul.f32 %v1378_v58, %v834_v29 }
 0x398   :  { %v855_v12 = vmul.f32 %v1380_v50, %v854_v61 }
 0x399   :  { %v836_v4 = vadd.f32 %v1378_v58, %v835_v9 }
 0x39a   :  { %v856_v62 = vadd.f32 %v1380_v50, %v855_v12 }
 0x39b   :  { %v840_v59 = vsel %vm839_vm3, %v1378_v58, %v836_v4 }
 0x39c   :  { %v845_v34 = vsel %vm842_vm4, %v844_v13, %v840_v59  ;;  %v860_v22 = vsel %vm859_vm7, %v1380_v50, %v856_v62  ;;  %v2460_v59 = vld [vmem:[#allocation38_spill] sm:$0xff] }
 0x39d   :  { %v868_v39 = vmul.f32 %v867_v20, %v845_v34  ;;  %v865_v24 = vsel %vm862_vm8, %v864_v23, %v860_v22  ;;  %v183_v34 = vadd.f32 %v2460_v59, %v2447_v14 }
 0x39e   :  { %v871_v33 = vsub.f32 1.0, %v865_v24  ;;  %v873_v27 = vmul.f32 %v865_v24, %v2270_v31 }
 0x39f   :  { %v869_v21 = vadd.f32 %v868_v39, %v218_v42  ;;  %v2461_v42 = vld [vmem:[#allocation27_spill] sm:$0xff] }
 0x3a1   :  { %1381 = vtanh.f32 %v869_v21 }
 0x3a7   :  { %v1382_v25 = vpop.eup %1381 }
 0x3a8   :  { %v872_v26 = vmul.f32 %v1382_v25, %v871_v33 }
 0x3aa   :  { %v2314_v28 = vadd.f32 %v873_v27, %v872_v26 }
 0x3ac   :  { %897 = vmatmul.f32.vlgmr.msra.gmra.mxu1 %v2314_v28  ;;  %917 = vmatmul.f32.vlgmr.msra.gmra.mxu2 %v2314_v28 }
 0x3ad   :  { %937 = vmatmul.f32.vlgmr.msrb.gmra.mxu3 %v2314_v28  ;;  %1149 = vmatpush.msra.mxu1 %v2151_v15 }
 0x3ae   :  { %1237 = vmatpush.msra.mxu2 %v1232_v8 }
 0x3af   :  { %1150 = vmatpush.msra.mxu1 %v2158_v17  ;;  %v2457_v17 = vld [vmem:[#allocation26_spill] sm:$0xff] }
 0x3b1   :  { %1151 = vmatpush.msra.mxu1 %v2165_v18 }
 0x3b3   :  { %1152 = vmatpush.msra.mxu1 %v2172_v36 }
 0x3b5   :  { %1153 = vmatpush.msra.mxu1 %v2179_v40  ;;  %v2458_v40 = vld [vmem:[#allocation36_spill] sm:$0xff] }
 0x3b7   :  { %1154 = vmatpush.msra.mxu1 %v2186_v45  ;;  %v180_v45 = vadd.f32 %v2458_v40, %v2447_v14 }
 0x3b9   :  { %1155 = vmatpush.msra.mxu1 %v2193_v47 }
 0x3bb   :  { %1156 = vmatpush.msra.mxu1 %v2200_v48 }
 0x3bd   :  { %1157 = vmatpush.msra.mxu1 %v2207_v49 }
 0x3bf   :  { %1158 = vmatpush.msra.mxu1 %v2214_v51 }
 0x3c1   :  { %1159 = vmatpush.msra.mxu1 %v2221_v52 }
 0x3c3   :  { %1160 = vmatpush.msra.mxu1 %v2228_v53 }
 0x3c5   :  { %1161 = vmatpush.msra.mxu1 %v2235_v54 }
 0x3c7   :  { %1162 = vmatpush.msra.mxu1 %v2242_v56 }
 0x3c9   :  { %1163 = vmatpush.msra.mxu1 %v2249_v57 }
 0x3cb   :  { %1164 = vmatpush.msra.mxu1 %v2256_v1 }
 0x429   :  { %v898_v15 = vpop.f32.mrf.mxu1 }
 0x42a   :  { %v941_v18 = vadd.f32 %v898_v15, %v2457_v17 }
 0x42c   :  { %v1317_v36 = vmul.f32 -1.442695, %v941_v18 }
 0x42e   :  { %1383 = vpow2.f32 %v1317_v36 }
 0x42f   :  { %v918_v47 = vpop.f32.mrf.mxu2 }
 0x430   :  { %v961_v48 = vadd.f32 %v918_v47, %v180_v45  ;;  %v938_v60 = vpop.f32.mrf.mxu3 }
 0x431   :  { %v981_v38 = vadd.f32 %v2341_v7, %v938_v60 }
 0x432   :  { %v1318_v49 = vmul.f32 -1.442695, %v961_v48 }
 0x434   :  { %v1384_v51 = vpop.eup %1383  ;;  %1385 = vpow2.f32 %v1318_v49 }
 0x435   :  { %v945_v52 = vadd.f32 1.0, %v1384_v51 }
 0x437   :  { %1387 = vrcp.f32 %v945_v52  ;;  %v957_v31 = vand.u32 2147483648, %v945_v52  ;;  %v955_v32 = vand.u32 2147483647, %v945_v52  ;;  %vm951_vm10 = vweird.f32 %v945_v52 }
 0x439   :  { %v958_v43 = vor.u32 1.1754944e-38, %v957_v31  ;;  %vm956_vm12 = vcmp.eq.f32.partialorder %v955_v32, 8.507059e+37 }
 0x43a   :  { %v1386_v53 = vpop.eup %1385 }
 0x43b   :  { %v965_v54 = vadd.f32 1.0, %v1386_v53 }
 0x43d   :  { %v1388_v56 = vpop.eup %1387  ;;  %1389 = vrcp.f32 %v965_v54  ;;  %v977_v63 = vand.u32 2147483648, %v965_v54  ;;  %v975_v41 = vand.u32 2147483647, %v965_v54  ;;  %vm971_vm14 = vweird.f32 %v965_v54 }
 0x43e   :  { %v947_v57 = vmul.f32 %v1388_v56, %v945_v52  ;;  %vm952_vm9 = vweird.f32 %v1388_v56 }
 0x43f   :  { %vm953_vm11 = vmor %vm951_vm10, %vm952_vm9  ;;  %v978_v9 = vor.u32 1.1754944e-38, %v977_v63  ;;  %vm976_vm0 = vcmp.eq.f32.partialorder %v975_v41, 8.507059e+37  ;;  %v2463_v63 = vld [vmem:[#allocation40_spill] sm:$0xff] }
 0x440   :  { %v948_v1 = vsub.f32 1.0, %v947_v57  ;;  %v186_v41 = vadd.f32 %v2463_v63, %v2447_v14  ;;  %v1221_v14 = vld [vmem:[#allocation6 + $0x20] sm:$0xff] }
 0x442   :  { %v949_v30 = vmul.f32 %v1388_v56, %v948_v1 }
 0x443   :  { %v1390_v37 = vpop.eup %1389 }
 0x444   :  { %v967_v55 = vmul.f32 %v1390_v37, %v965_v54  ;;  %v950_v35 = vadd.f32 %v1388_v56, %v949_v30  ;;  %vm972_vm13 = vweird.f32 %v1390_v37 }
 0x445   :  { %vm973_vm15 = vmor %vm971_vm14, %vm972_vm13 }
 0x446   :  { %v968_v3 = vsub.f32 1.0, %v967_v55  ;;  %v954_v5 = vsel %vm953_vm11, %v1388_v56, %v950_v35  ;;  %v2462_v56 = vld [vmem:[#allocation39_spill] sm:$0xff] }
 0x447   :  { %v959_v6 = vsel %vm956_vm12, %v958_v43, %v954_v5  ;;  %v224_v57 = vadd.f32 %v2462_v56, %v2001_v44 }
 0x448   :  { %v969_v58 = vmul.f32 %v1390_v37, %v968_v3  ;;  %v982_v50 = vmul.f32 %v981_v38, %v959_v6  ;;  %v1230_v6 = vld [vmem:[#allocation6 + $0x68] sm:$0xff] }
 0x44a   :  { %v983_v29 = vadd.f32 %v982_v50, %v221_v10  ;;  %v970_v2 = vadd.f32 %v1390_v37, %v969_v58  ;;  %v1231_v10 = vld [vmem:[#allocation6 + $0x70] sm:$0xff]  ;;  %v1229_v58 = vld [vmem:[#allocation6 + $0x60] sm:$0xff]  ;;  %v1228_v50 = vld [vmem:[#allocation6 + $0x58] sm:$0xff] }
 0x44b   :  { %1238 = vmatpush.msra.mxu2 %v1231_v10 }
 0x44c   :  { %1391 = vtanh.f32 %v983_v29  ;;  %v974_v61 = vsel %vm973_vm15, %v1390_v37, %v970_v2  ;;  %v1227_v29 = vld [vmem:[#allocation6 + $0x50] sm:$0xff] }
 0x44d   :  { %v979_v0 = vsel %vm976_vm0, %v978_v9, %v974_v61  ;;  %1239 = vmatpush.msra.mxu2 %v1230_v6  ;;  %v1226_v9 = vld [vmem:[#allocation6 + $0x48] sm:$0xff] }
 0x44e   :  { %v985_v46 = vsub.f32 1.0, %v979_v0  ;;  %v987_v13 = vmul.f32 %v979_v0, %v2314_v28 }
 0x44f   :  { %1240 = vmatpush.msra.mxu2 %v1229_v58 }
 0x451   :  { %1241 = vmatpush.msra.mxu2 %v1228_v50 }
 0x452   :  { %v1392_v12 = vpop.eup %1391 }
 0x453   :  { %v986_v4 = vmul.f32 %v1392_v12, %v985_v46  ;;  %1242 = vmatpush.msra.mxu2 %v1227_v29  ;;  %v1225_v46 = vld [vmem:[#allocation6 + $0x40] sm:$0xff]  ;;  %v1224_v12 = vld [vmem:[#allocation6 + $0x38] sm:$0xff] }
 0x455   :  { %v988_v20 = vadd.f32 %v987_v13, %v986_v4  ;;  %1243 = vmatpush.msra.mxu2 %v1226_v9  ;;  %v1223_v4 = vld [vmem:[#allocation6 + $0x30] sm:$0xff] }
 0x457   :  { %1011 = vmatmul.f32.vlgmr.msrb.gmra.mxu0 %v988_v20  ;;  %1031 = vmatmul.f32.vlgmr.msrb.gmra.mxu1 %v988_v20 }
 0x458   :  { %1051 = vmatmul.f32.vlgmr.msrb.gmra.mxu2 %v988_v20 }
 0x459   :  { %1244 = vmatpush.msra.mxu2 %v1225_v46 }
 0x45b   :  { %1245 = vmatpush.msra.mxu2 %v1224_v12 }
 0x45d   :  { %1246 = vmatpush.msra.mxu2 %v1223_v4 }
 0x4d4   :  { %v1012_v62 = vpop.f32.mrf.mxu0  ;;  %v1032_v11 = vpop.f32.mrf.mxu1 }
 0x4d5   :  { %v1055_v16 = vadd.f32 %v1012_v62, %v2461_v42  ;;  %v1075_v39 = vadd.f32 %v1032_v11, %v183_v34  ;;  %v1222_v34 = vld [vmem:[#allocation6 + $0x28] sm:$0xff]  ;;  %v1220_v42 = vld [vmem:[#allocation6 + $0x18] sm:$0xff] }
 0x4d6   :  { %1247 = vmatpush.msra.mxu2 %v1222_v34 }
 0x4d7   :  { %v1319_v19 = vmul.f32 -1.442695, %v1055_v16  ;;  %v1320_v21 = vmul.f32 -1.442695, %v1075_v39  ;;  %v1219_v39 = vld [vmem:[#allocation6 + $0x10] sm:$0xff] }
 0x4d8   :  { %1248 = vmatpush.msra.mxu2 %v1221_v14 }
 0x4d9   :  { %1393 = vpow2.f32 %v1319_v19  ;;  %v1218_v19 = vld [vmem:[#allocation6 + $0x8] sm:$0xff] }
 0x4da   :  { %1395 = vpow2.f32 %v1320_v21  ;;  %1249 = vmatpush.msra.mxu2 %v1220_v42 }
 0x4db   :  { %v1052_v47 = vpop.f32.mrf.mxu2 }
 0x4dc   :  { %v1095_v52 = vadd.f32 %v2341_v7, %v1052_v47  ;;  %1250 = vmatpush.msra.mxu2 %v1219_v39 }
 0x4de   :  { %1251 = vmatpush.msra.mxu2 %v1218_v19 }
 0x4df   :  { %v1394_v22 = vpop.eup %1393 }
 0x4e0   :  { %v1396_v23 = vpop.eup %1395  ;;  %v1059_v24 = vadd.f32 1.0, %v1394_v22  ;;  %v1217_v22 = vld [vmem:[#allocation6] sm:$0xff] }
 0x4e1   :  { %v1079_v33 = vadd.f32 1.0, %v1396_v23  ;;  %1252 = vmatpush.msra.mxu2 %v1217_v22 }
 0x4e2   :  { %1397 = vrcp.f32 %v1059_v24  ;;  %v1071_v18 = vand.u32 2147483648, %v1059_v24  ;;  %v1069_v40 = vand.u32 2147483647, %v1059_v24  ;;  %vm1065_vm2 = vweird.f32 %v1059_v24 }
 0x4e3   :  { %1399 = vrcp.f32 %v1079_v33  ;;  %v1091_v31 = vand.u32 2147483648, %v1079_v33  ;;  %vm1085_vm6 = vweird.f32 %v1079_v33  ;;  %v1089_v30 = vand.u32 2147483647, %v1079_v33 }
 0x4e4   :  { %v1072_v49 = vor.u32 1.1754944e-38, %v1071_v18  ;;  %vm1070_vm4 = vcmp.eq.f32.partialorder %v1069_v40, 8.507059e+37 }
 0x4e5   :  { %v1092_v60 = vor.u32 1.1754944e-38, %v1091_v31  ;;  %vm1090_vm8 = vcmp.eq.f32.partialorder %v1089_v30, 8.507059e+37 }
 0x4e8   :  { %v1398_v25 = vpop.eup %1397 }
 0x4e9   :  { %v1400_v26 = vpop.eup %1399  ;;  %v1061_v27 = vmul.f32 %v1398_v25, %v1059_v24  ;;  %vm1066_vm1 = vweird.f32 %v1398_v25 }
 0x4ea   :  { %v1081_v28 = vmul.f32 %v1400_v26, %v1079_v33  ;;  %vm1067_vm3 = vmor %vm1065_vm2, %vm1066_vm1  ;;  %vm1086_vm5 = vweird.f32 %v1400_v26 }
 0x4eb   :  { %v1062_v15 = vsub.f32 1.0, %v1061_v27  ;;  %vm1087_vm7 = vmor %vm1085_vm6, %vm1086_vm5 }
 0x4ec   :  { %v1082_v17 = vsub.f32 1.0, %v1081_v28 }
 0x4ed   :  { %v1063_v36 = vmul.f32 %v1398_v25, %v1062_v15 }
 0x4ee   :  { %v1083_v45 = vmul.f32 %v1400_v26, %v1082_v17 }
 0x4ef   :  { %v1064_v48 = vadd.f32 %v1398_v25, %v1063_v36 }
 0x4f0   :  { %v1084_v54 = vadd.f32 %v1400_v26, %v1083_v45 }
 0x4f1   :  { %v1068_v51 = vsel %vm1067_vm3, %v1398_v25, %v1064_v48 }
 0x4f2   :  { %v1073_v53 = vsel %vm1070_vm4, %v1072_v49, %v1068_v51  ;;  %v1088_v37 = vsel %vm1087_vm7, %v1400_v26, %v1084_v54 }
 0x4f3   :  { %v1096_v1 = vmul.f32 %v1095_v52, %v1073_v53  ;;  %v1093_v55 = vsel %vm1090_vm8, %v1092_v60, %v1088_v37  ;;  %v2465_v53 = vld [vmem:[#allocation41_spill] sm:$0xff] }
 0x4f4   :  { %v1099_v35 = vsub.f32 1.0, %v1093_v55  ;;  %v1101_v5 = vmul.f32 %v1093_v55, %v988_v20  ;;  %v2464_v20 = vld [vmem:[#allocation28_spill] sm:$0xff]  ;;  %v227_v54 = vadd.f32 %v2465_v53, %v2001_v44  ;;  %v1332_v44 = vld [vmem:[%s2377_s6] ss:$0 sm:$0xff] }
 0x4f5   :  { %v1097_v32 = vadd.f32 %v1096_v1, %v224_v57 }
 0x4f7   :  { %1401 = vtanh.f32 %v1097_v32 }
 0x4fd   :  { %v1402_v43 = vpop.eup %1401 }
 0x4fe   :  { %v1100_v3 = vmul.f32 %v1402_v43, %v1099_v35 }
 0x500   :  { %v2353_v38 = vadd.f32 %v1101_v5, %v1100_v3 }
 0x502   :  { %1125 = vmatmul.f32.vlgmr.msra.gmra.mxu3 %v2353_v38  ;;  %1145 = vmatmul.f32.vlgmr.msra.gmra.mxu0 %v2353_v38 }
 0x503   :  { %1165 = vmatmul.f32.vlgmr.msra.gmra.mxu1 %v2353_v38 }
 0x57f   :  { %v1146_v2 = vpop.f32.mrf.mxu0 }
 0x580   :  { %v1189_v61 = vadd.f32 %v1146_v2, %v186_v41  ;;  %v1166_v40 = vpop.f32.mrf.mxu1 }
 0x581   :  { %v1209_v48 = vadd.f32 %v2341_v7, %v1166_v40 }
 0x582   :  { %v1322_v0 = vmul.f32 -1.442695, %v1189_v61 }
 0x584   :  { %1403 = vpow2.f32 %v1322_v0 }
 0x585   :  { %v1126_v13 = vpop.f32.mrf.mxu3 }
 0x586   :  { %v1169_v59 = vadd.f32 %v1126_v13, %v2464_v20 }
 0x588   :  { %v1321_v62 = vmul.f32 -1.442695, %v1169_v59 }
 0x58a   :  { %v1404_v11 = vpop.eup %1403  ;;  %1405 = vpow2.f32 %v1321_v62 }
 0x58b   :  { %v1193_v16 = vadd.f32 1.0, %v1404_v11 }
 0x58d   :  { %1407 = vrcp.f32 %v1193_v16  ;;  %v1205_v56 = vand.u32 2147483648, %v1193_v16  ;;  %vm1199_vm14 = vweird.f32 %v1193_v16  ;;  %v1203_v1 = vand.u32 2147483647, %v1193_v16 }
 0x58f   :  { %v1206_v32 = vor.u32 1.1754944e-38, %v1205_v56  ;;  %vm1204_vm0 = vcmp.eq.f32.partialorder %v1203_v1, 8.507059e+37 }
 0x590   :  { %v1406_v21 = vpop.eup %1405 }
 0x591   :  { %v1173_v23 = vadd.f32 1.0, %v1406_v21 }
 0x593   :  { %1409 = vrcp.f32 %v1173_v23  ;;  %v1408_v24 = vpop.eup %1407  ;;  %v1185_v15 = vand.u32 2147483648, %v1173_v23  ;;  %v1183_v18 = vand.u32 2147483647, %v1173_v23  ;;  %vm1179_vm10 = vweird.f32 %v1173_v23 }
 0x594   :  { %v1195_v33 = vmul.f32 %v1408_v24, %v1193_v16  ;;  %vm1200_vm13 = vweird.f32 %v1408_v24 }
 0x595   :  { %v1186_v47 = vor.u32 1.1754944e-38, %v1185_v15  ;;  %vm1184_vm12 = vcmp.eq.f32.partialorder %v1183_v18, 8.507059e+37  ;;  %vm1201_vm15 = vmor %vm1199_vm14, %vm1200_vm13 }
 0x596   :  { %v1196_v27 = vsub.f32 1.0, %v1195_v33 }
 0x598   :  { %v1197_v36 = vmul.f32 %v1408_v24, %v1196_v27 }
 0x599   :  { %v1410_v25 = vpop.eup %1409 }
 0x59a   :  { %v1175_v26 = vmul.f32 %v1410_v25, %v1173_v23  ;;  %vm1180_vm9 = vweird.f32 %v1410_v25  ;;  %v1198_v52 = vadd.f32 %v1408_v24, %v1197_v36 }
 0x59b   :  { %vm1181_vm11 = vmor %vm1179_vm10, %vm1180_vm9 }
 0x59c   :  { %v1176_v28 = vsub.f32 1.0, %v1175_v26  ;;  %v1202_v30 = vsel %vm1201_vm15, %v1408_v24, %v1198_v52 }
 0x59d   :  { %v1207_v37 = vsel %vm1204_vm0, %v1206_v32, %v1202_v30 }
 0x59e   :  { %v1177_v17 = vmul.f32 %v1410_v25, %v1176_v28  ;;  %v1213_v7 = vsub.f32 1.0, %v1207_v37  ;;  %v1215_v35 = vmul.f32 %v1207_v37, %v2353_v38 }
 0x5a0   :  { %v1178_v45 = vadd.f32 %v1410_v25, %v1177_v17 }
 0x5a2   :  { %v1182_v49 = vsel %vm1181_vm11, %v1410_v25, %v1178_v45 }
 0x5a3   :  { %v1187_v51 = vsel %vm1184_vm12, %v1186_v47, %v1182_v49 }
 0x5a4   :  { %v1210_v57 = vmul.f32 %v1209_v48, %v1187_v51 }
 0x5a6   :  { %v1211_v31 = vadd.f32 %v1210_v57, %v227_v54 }
 0x5a8   :  { %1411 = vtanh.f32 %v1211_v31 }
 0x5ae   :  { %v1412_v60 = vpop.eup %1411 }
 0x5af   :  { %v1214_v55 = vmul.f32 %v1412_v60, %v1213_v7 }
 0x5b1   :  { %v1216_v43 = vadd.f32 %v1215_v35, %v1214_v55 }
 0x5b3   :  { %1253 = vmatmul.f32.vlgmr.msra.gmra.mxu2 %v1216_v43 }
 0x636   :  { %v1254_v3 = vpop.f32.mrf.mxu2 }
 0x637   :  { %v1255_v5 = vadd.f32 %v1332_v44, %v1254_v3 }
 0x639   :  { %1257 = vst [vmem:[#allocation8] sm:$0xff] %v1255_v5 }
 0x63a   :  { %1268 = dma.vmem_to_hbm [thread:$0]  %s1264_s21, 128, %s1266_s24, [#allocation5]  }
 0x63b   :  { %1538 = dma.done.wait [#allocation5], 128  }
 0x63c   :  { %1539 = vsyncadd [#allocation5], 4294967168 }
 0x63d   :  { %1273 = vsyncpa [#allocation4], 1 }
 0x63e   :  { %1274 = vsyncpa [#allocation7], 1 }
 0x63f   :  { %1275 = vsyncpa [#allocation5], 1 }

</bundles_post_ra>
